<compile_context>
chip_gen: v7x
topology: tpu7x:2x2x1
jax: 0.10.0
libtpu: 0.0.40
codegen_flags: <defaults>
</compile_context>

<pallas_src>
import functools

import jax
import jax.numpy as jnp
from jax import lax
from jax.experimental import pallas as pl
from jax.experimental.pallas import tpu as pltpu


def _round_up(x, m):
    return (x + m - 1) // m * m


def _gru_kernel(gx_ref, whh_ref, bhn_ref, h_ref, *,
                hidden_pad, t_chunk, t_total, unroll):
    """One grid step advances the recurrence by up to `t_chunk` timesteps.

    gx_ref : (TB, Bp, 3*Hp) precomputed x@W_ih^T + b_ih (+ b_hh for r,z), gate-aligned
    whh_ref: (Hp, 3*Hp)     W_hh^T, gate-aligned columns (grid-invariant)
    bhn_ref: (1, Hp)        b_hh for the n gate
    h_ref  : (Bp, Hp)       output block; resident accumulator carrying h across chunks
    """
    c = pl.program_id(0)
    nc = pl.num_programs(0)
    hp = hidden_pad
    bp = h_ref.shape[0]

    @pl.when(c == 0)
    def _():
        h_ref[...] = jnp.zeros_like(h_ref)

    # Hoisted loop invariants (broadcasts are not CSE'd inside loops).
    bhn = jnp.broadcast_to(bhn_ref[...], (bp, hp))
    whh = whh_ref[...]

    def step(i, h):
        gx = gx_ref[i]                                        # (Bp, 3Hp)
        gh = jnp.dot(h, whh,
                     preferred_element_type=jnp.float32)      # (Bp, 3Hp)
        # Lane-aligned gate slabs: offsets 0, Hp, 2Hp are 128-multiples.
        # sigmoid(x) == 0.5*tanh(0.5*x) + 0.5  -> single EUP op per gate.
        r = 0.5 * jnp.tanh(0.5 * (gx[:, 0:hp] + gh[:, 0:hp])) + 0.5
        z = 0.5 * jnp.tanh(0.5 * (gx[:, hp:2 * hp] + gh[:, hp:2 * hp])) + 0.5
        n = jnp.tanh(gx[:, 2 * hp:3 * hp] + r * (gh[:, 2 * hp:3 * hp] + bhn))
        return n + z * (h - n)                                # == (1-z)*n + z*h

    tail = t_total % t_chunk
    if tail == 0:
        # Every chunk runs exactly t_chunk valid steps -> no masking anywhere.
        h_ref[...] = lax.fori_loop(0, t_chunk, step, h_ref[...], unroll=unroll)
    else:
        # Only the last chunk is partial; give it a shorter *static* trip count
        # instead of a per-step select on every timestep of every chunk.
        @pl.when(c != nc - 1)
        def _():
            h_ref[...] = lax.fori_loop(0, t_chunk, step, h_ref[...],
                                       unroll=unroll)

        @pl.when(c == nc - 1)
        def _():
            h_ref[...] = lax.fori_loop(0, tail, step, h_ref[...],
                                       unroll=min(unroll, tail))


def _pad_gate_cols(w_t, h, hp):
    """(rows, 3h) -> (rows, 3hp): pad each gate segment to hp lanes."""
    parts = jnp.split(w_t, 3, axis=-1)
    return jnp.concatenate(
        [jnp.pad(p, ((0, 0), (0, hp - h))) for p in parts], axis=-1)


def _pick_time_chunk(T, Bp, Hp, budget_bytes):
    """Largest time chunk whose double-buffered gx block fits the VMEM budget.

    Prefers a chunk that divides T exactly (no tail chunk at all); falls back
    to the budget cap (tail handled by a static shorter loop in the kernel).
    """
    per_step = 2 * Bp * 3 * Hp * 4          # two pipeline buffers, f32
    cap = max(1, min(budget_bytes // per_step, T, 256))
    best_div = 1
    for tb in range(cap, 0, -1):
        if T % tb == 0:
            best_div = tb
            break
    if best_div >= max(1, cap // 2):
        return best_div
    return cap


@jax.jit
def gru_forward(x, params):
    """x: (B, T, F) float32.  Returns (B * output_size,) like pred.view(-1)."""
    B, T, F = x.shape
    H = params["weight_hh"].shape[1]

    Bp = _round_up(B, 8)       # f32 sublane tile (pad to 16 if weights go bf16)
    Hp = _round_up(H, 128)     # lane tile; each gate slab starts on a 128 boundary

    # gx double-buffer budget: conservative for v7x (64 MiB physical VMEM) and
    # v5e (16 MiB scoped default before vmem_limit_bytes override below).
    TB = _pick_time_chunk(T, Bp, Hp, budget_bytes=16 * 2 ** 20)
    n_chunks = -(-T // TB)      # cdiv

    hi = jax.lax.Precision.HIGHEST

    # ---- weight / bias layout prep (gate-aligned, lane-padded) ----
    wih_t = _pad_gate_cols(params["weight_ih"].T, H, Hp)              # (F, 3Hp)
    whh_t = _pad_gate_cols(params["weight_hh"].T, H, Hp)              # (H, 3Hp)
    whh_t = jnp.pad(whh_t, ((0, Hp - H), (0, 0)))                     # (Hp, 3Hp)

    bih, bhh = params["bias_ih"], params["bias_hh"]
    # Fold b_ih (all gates) and b_hh (r, z gates) into the precomputed projection.
    b_r = bih[0:H] + bhh[0:H]
    b_z = bih[H:2 * H] + bhh[H:2 * H]
    b_n = bih[2 * H:3 * H]
    gx_bias = jnp.concatenate([jnp.pad(b_r, (0, Hp - H)),
                               jnp.pad(b_z, (0, Hp - H)),
                               jnp.pad(b_n, (0, Hp - H))])            # (3Hp,)
    bhn = jnp.pad(bhh[2 * H:3 * H], (0, Hp - H))[None, :]             # (1, Hp)

    # ---- hoisted input projection for all timesteps (one big matmul),
    #      emitted time-major so the kernel needs no transpose of x.
    #      HIGHEST keeps 1e-5 fidelity to the f32 reference; at production
    #      sizes relax to default precision / bf16 inputs (f32 accumulate). ----
    x_p = jnp.pad(x, ((0, Bp - B), (0, 0), (0, 0)))                   # (Bp, T, F)
    gx = jnp.einsum("btf,fg->tbg", x_p, wih_t, precision=hi) + gx_bias  # (T, Bp, 3Hp)

    # Explicit VMEM limit so the scoped default (16 MiB v5e / 32 MiB v6e,v7x)
    # never silently gates double-buffering; kept under v7x's 64 MiB physical.
    gx_bytes = 2 * TB * Bp * 3 * Hp * 4
    whh_bytes = 2 * Hp * 3 * Hp * 4
    misc_bytes = 2 * Hp * 4 + 2 * Bp * Hp * 4
    vmem_limit = int(min(max(2 * (gx_bytes + whh_bytes + misc_bytes), 32 * 2 ** 20),
                         60 * 2 ** 20))

    kernel = functools.partial(_gru_kernel, hidden_pad=Hp, t_chunk=TB,
                               t_total=T, unroll=min(8, TB))

    # NOTE: for production sizes: (a) cast W_hh^T / gx to bf16 (f32 accumulate,
    # Bp padded to 16), (b) single-buffer the grid-invariant W_hh^T / b_hn
    # blocks (pipeline_mode=pl.Buffered(1)) to recover VMEM on v7x, (c) add a
    # leading "parallel" batch-tile grid axis to use both v7x TensorCores.
    # Skipped here: tiny toy B/H and the 1e-5 fidelity check dominate.
    h_last = pl.pallas_call(
        kernel,
        out_shape=jax.ShapeDtypeStruct((Bp, Hp), jnp.float32),
        grid_spec=pltpu.PrefetchScalarGridSpec(
            num_scalar_prefetch=0,
            grid=(n_chunks,),
            in_specs=[
                pl.BlockSpec((TB, Bp, 3 * Hp), lambda c: (c, 0, 0)),  # gx chunk (streamed)
                pl.BlockSpec((Hp, 3 * Hp), lambda c: (0, 0)),         # W_hh^T (resident)
                pl.BlockSpec((1, Hp), lambda c: (0, 0)),              # b_hn
            ],
            # Hidden state is carried directly in the resident output block.
            out_specs=pl.BlockSpec((Bp, Hp), lambda c: (0, 0)),
        ),
        compiler_params=pltpu.CompilerParams(
            dimension_semantics=("arbitrary",),
            vmem_limit_bytes=vmem_limit),
    )(gx, whh_t, bhn)

    # Linear head on the last hidden state: trivial matmul done in the wrapper
    # so its weights never occupy VMEM pipeline buffers inside the kernel.
    pred = (jnp.dot(h_last[:B, :H], params["weight_lin"].T, precision=hi)
            + params["bias_lin"])
    return pred.reshape(-1)


def _reference_forward(x, params):
    """Pure-JAX reference mirroring torch.nn.GRU + Linear for verification."""
    B, T, F = x.shape
    H = params["weight_hh"].shape[1]
    wih, whh = params["weight_ih"], params["weight_hh"]
    bih, bhh = params["bias_ih"], params["bias_hh"]
    hi = jax.lax.Precision.HIGHEST

    def step(h, x_t):
        gx = jnp.dot(x_t, wih.T, precision=hi) + bih
        gh = jnp.dot(h, whh.T, precision=hi) + bhh
        r = jax.nn.sigmoid(gx[:, :H] + gh[:, :H])
        z = jax.nn.sigmoid(gx[:, H:2 * H] + gh[:, H:2 * H])
        n = jnp.tanh(gx[:, 2 * H:] + r * gh[:, 2 * H:])
        h_new = (1.0 - z) * n + z * h
        return h_new, None

    h0 = jnp.zeros((B, H), jnp.float32)
    h_last, _ = jax.lax.scan(step, h0, jnp.transpose(x, (1, 0, 2)))
    pred = jnp.dot(h_last, params["weight_lin"].T, precision=hi) + params["bias_lin"]
    return pred.reshape(-1)


def init_params(key, input_size, hidden_size, output_size):
    """Deterministic init mimicking PyTorch's uniform(-1/sqrt(H), 1/sqrt(H))."""
    ks = jax.random.split(key, 6)
    bound = 1.0 / jnp.sqrt(hidden_size)
    u = lambda k, shape, b: jax.random.uniform(k, shape, jnp.float32, -b, b)
    return {
        "weight_ih": u(ks[0], (3 * hidden_size, input_size), bound),
        "weight_hh": u(ks[1], (3 * hidden_size, hidden_size), bound),
        "bias_ih": u(ks[2], (3 * hidden_size,), bound),
        "bias_hh": u(ks[3], (3 * hidden_size,), bound),
        "weight_lin": u(ks[4], (output_size, hidden_size), bound),
        "bias_lin": u(ks[5], (output_size,), bound),
    }


if __name__ == "__main__":
    B, T, F, H, O = 4, 8, 16, 32, 1

    key = jax.random.PRNGKey(0)
    k_x, k_p = jax.random.split(key)
    x = jax.random.normal(k_x, (B, T, F), jnp.float32)
    params = init_params(k_p, F, H, O)

    pred = gru_forward(x, params)
    pred = jax.block_until_ready(pred)

    ref = _reference_forward(x, params)
    assert pred.shape == (B * O,)
    assert jnp.allclose(pred, ref, atol=1e-5, rtol=1e-5), (pred, ref)

    print("KERNEL_OK")
</pallas_src>

<mosaic_0001>
module attributes {stable_mosaic.version = 11 : i64} {
  func.func @_gru_kernel(%arg0: i32, %arg1: memref<8x8x384xf32, #tpu.memory_space<vmem>>, %arg2: memref<128x384xf32, #tpu.memory_space<vmem>>, %arg3: memref<1x128xf32, #tpu.memory_space<vmem>>, %arg4: memref<8x128xf32, #tpu.memory_space<vmem>>) attributes {dimension_semantics = [#tpu.dimension_semantics<arbitrary>], iteration_bounds = array<i64: 1>, scalar_prefetch = 0 : i64, scratch_operands = 0 : i64, tpu.core_type = #tpu.core_type<tc>, window_params = [{transform_indices = @transform_0, window_bounds = array<i64: 8, 8, 384>}, {pipeline_mode = #tpu.pipeline_mode<synchronous>, transform_indices = @transform_1, window_bounds = array<i64: 128, 384>}, {pipeline_mode = #tpu.pipeline_mode<synchronous>, transform_indices = @transform_2, window_bounds = array<i64: 1, 128>}, {pipeline_mode = #tpu.pipeline_mode<synchronous>, transform_indices = @transform_3, window_bounds = array<i64: 8, 128>}]} {
    %c0_i32 = arith.constant 0 : i32
    %0 = arith.cmpi eq, %arg0, %c0_i32 : i32
    %1 = arith.extui %0 : i1 to i32
    %c0_i32_0 = arith.constant 0 : i32
    %2 = arith.cmpi ne, %1, %c0_i32_0 : i32
    scf.if %2 {
      %cst_80 = arith.constant 0.000000e+00 : f32
      %273 = vector.broadcast %cst_80 : f32 to vector<8x128xf32>
      %c0_81 = arith.constant 0 : index
      %c0_82 = arith.constant 0 : index
      %274 = vector.load %arg4[%c0_81, %c0_82] : memref<8x128xf32, #tpu.memory_space<vmem>>, vector<8x128xf32>
      tpu.vector_store %arg4[%c0_81, %c0_82], %273 {strides = array<i32>} : memref<8x128xf32, #tpu.memory_space<vmem>>, vector<8x128xf32>,
    } else {
    }
    %c0 = arith.constant 0 : index
    %c0_1 = arith.constant 0 : index
    %3 = vector.load %arg3[%c0, %c0_1] : memref<1x128xf32, #tpu.memory_space<vmem>>, vector<1x128xf32>
    %4 = vector.shape_cast %3 : vector<1x128xf32> to vector<1x128xf32>
    %5 = vector.broadcast %4 : vector<1x128xf32> to vector<8x128xf32>
    %c0_2 = arith.constant 0 : index
    %c0_3 = arith.constant 0 : index
    %6 = vector.load %arg2[%c0_2, %c0_3] : memref<128x384xf32, #tpu.memory_space<vmem>>, vector<128x384xf32>
    %c0_4 = arith.constant 0 : index
    %c0_5 = arith.constant 0 : index
    %7 = vector.load %arg4[%c0_4, %c0_5] : memref<8x128xf32, #tpu.memory_space<vmem>>, vector<8x128xf32>
    %c0_i32_6 = arith.constant 0 : i32
    %8 = arith.index_cast %c0_i32_6 : i32 to index
    %c0_7 = arith.constant 0 : index
    %c0_8 = arith.constant 0 : index
    %9 = vector.load %arg1[%8, %c0_7, %c0_8] : memref<8x8x384xf32, #tpu.memory_space<vmem>>, vector<1x8x384xf32>
    %10 = vector.shape_cast %9 : vector<1x8x384xf32> to vector<8x384xf32>
    %cst = arith.constant dense<0.000000e+00> : vector<8x384xf32>
    %11 = tpu.matmul %7, %6, %cst {dimension_numbers = #tpu.dot_dimension_numbers<[1], [0], [0], [1], [0, 0, 1, 1], [], []>} : vector<8x128xf32>, vector<128x384xf32>, vector<8x384xf32> -> vector<8x384xf32>
    %12 = vector.extract_strided_slice %10 {offsets = [0, 0], sizes = [8, 128], strides = [1, 1]} : vector<8x384xf32> to vector<8x128xf32>
    %13 = vector.extract_strided_slice %11 {offsets = [0, 0], sizes = [8, 128], strides = [1, 1]} : vector<8x384xf32> to vector<8x128xf32>
    %14 = arith.addf %12, %13 : vector<8x128xf32>
    %cst_9 = arith.constant 5.000000e-01 : f32
    %15 = vector.broadcast %cst_9 : f32 to vector<8x128xf32>
    %16 = arith.mulf %15, %14 : vector<8x128xf32>
    %17 = math.tanh %16 : vector<8x128xf32>
    %cst_10 = arith.constant 5.000000e-01 : f32
    %18 = vector.broadcast %cst_10 : f32 to vector<8x128xf32>
    %19 = arith.mulf %18, %17 : vector<8x128xf32>
    %cst_11 = arith.constant 5.000000e-01 : f32
    %20 = vector.broadcast %cst_11 : f32 to vector<8x128xf32>
    %21 = arith.addf %19, %20 : vector<8x128xf32>
    %22 = vector.extract_strided_slice %10 {offsets = [0, 128], sizes = [8, 128], strides = [1, 1]} : vector<8x384xf32> to vector<8x128xf32>
    %23 = vector.extract_strided_slice %11 {offsets = [0, 128], sizes = [8, 128], strides = [1, 1]} : vector<8x384xf32> to vector<8x128xf32>
    %24 = arith.addf %22, %23 : vector<8x128xf32>
    %cst_12 = arith.constant 5.000000e-01 : f32
    %25 = vector.broadcast %cst_12 : f32 to vector<8x128xf32>
    %26 = arith.mulf %25, %24 : vector<8x128xf32>
    %27 = math.tanh %26 : vector<8x128xf32>
    %cst_13 = arith.constant 5.000000e-01 : f32
    %28 = vector.broadcast %cst_13 : f32 to vector<8x128xf32>
    %29 = arith.mulf %28, %27 : vector<8x128xf32>
    %cst_14 = arith.constant 5.000000e-01 : f32
    %30 = vector.broadcast %cst_14 : f32 to vector<8x128xf32>
    %31 = arith.addf %29, %30 : vector<8x128xf32>
    %32 = vector.extract_strided_slice %10 {offsets = [0, 256], sizes = [8, 128], strides = [1, 1]} : vector<8x384xf32> to vector<8x128xf32>
    %33 = vector.extract_strided_slice %11 {offsets = [0, 256], sizes = [8, 128], strides = [1, 1]} : vector<8x384xf32> to vector<8x128xf32>
    %34 = arith.addf %33, %5 : vector<8x128xf32>
    %35 = arith.mulf %21, %34 : vector<8x128xf32>
    %36 = arith.addf %32, %35 : vector<8x128xf32>
    %37 = math.tanh %36 : vector<8x128xf32>
    %38 = arith.subf %7, %37 : vector<8x128xf32>
    %39 = arith.mulf %31, %38 : vector<8x128xf32>
    %40 = arith.addf %37, %39 : vector<8x128xf32>
    %c1_i32 = arith.constant 1 : i32
    %41 = arith.index_cast %c1_i32 : i32 to index
    %c0_15 = arith.constant 0 : index
    %c0_16 = arith.constant 0 : index
    %42 = vector.load %arg1[%41, %c0_15, %c0_16] : memref<8x8x384xf32, #tpu.memory_space<vmem>>, vector<1x8x384xf32>
    %43 = vector.shape_cast %42 : vector<1x8x384xf32> to vector<8x384xf32>
    %cst_17 = arith.constant dense<0.000000e+00> : vector<8x384xf32>
    %44 = tpu.matmul %40, %6, %cst_17 {dimension_numbers = #tpu.dot_dimension_numbers<[1], [0], [0], [1], [0, 0, 1, 1], [], []>} : vector<8x128xf32>, vector<128x384xf32>, vector<8x384xf32> -> vector<8x384xf32>
    %45 = vector.extract_strided_slice %43 {offsets = [0, 0], sizes = [8, 128], strides = [1, 1]} : vector<8x384xf32> to vector<8x128xf32>
    %46 = vector.extract_strided_slice %44 {offsets = [0, 0], sizes = [8, 128], strides = [1, 1]} : vector<8x384xf32> to vector<8x128xf32>
    %47 = arith.addf %45, %46 : vector<8x128xf32>
    %cst_18 = arith.constant 5.000000e-01 : f32
    %48 = vector.broadcast %cst_18 : f32 to vector<8x128xf32>
    %49 = arith.mulf %48, %47 : vector<8x128xf32>
    %50 = math.tanh %49 : vector<8x128xf32>
    %cst_19 = arith.constant 5.000000e-01 : f32
    %51 = vector.broadcast %cst_19 : f32 to vector<8x128xf32>
    %52 = arith.mulf %51, %50 : vector<8x128xf32>
    %cst_20 = arith.constant 5.000000e-01 : f32
    %53 = vector.broadcast %cst_20 : f32 to vector<8x128xf32>
    %54 = arith.addf %52, %53 : vector<8x128xf32>
    %55 = vector.extract_strided_slice %43 {offsets = [0, 128], sizes = [8, 128], strides = [1, 1]} : vector<8x384xf32> to vector<8x128xf32>
    %56 = vector.extract_strided_slice %44 {offsets = [0, 128], sizes = [8, 128], strides = [1, 1]} : vector<8x384xf32> to vector<8x128xf32>
    %57 = arith.addf %55, %56 : vector<8x128xf32>
    %cst_21 = arith.constant 5.000000e-01 : f32
    %58 = vector.broadcast %cst_21 : f32 to vector<8x128xf32>
    %59 = arith.mulf %58, %57 : vector<8x128xf32>
    %60 = math.tanh %59 : vector<8x128xf32>
    %cst_22 = arith.constant 5.000000e-01 : f32
    %61 = vector.broadcast %cst_22 : f32 to vector<8x128xf32>
    %62 = arith.mulf %61, %60 : vector<8x128xf32>
    %cst_23 = arith.constant 5.000000e-01 : f32
    %63 = vector.broadcast %cst_23 : f32 to vector<8x128xf32>
    %64 = arith.addf %62, %63 : vector<8x128xf32>
    %65 = vector.extract_strided_slice %43 {offsets = [0, 256], sizes = [8, 128], strides = [1, 1]} : vector<8x384xf32> to vector<8x128xf32>
    %66 = vector.extract_strided_slice %44 {offsets = [0, 256], sizes = [8, 128], strides = [1, 1]} : vector<8x384xf32> to vector<8x128xf32>
    %67 = arith.addf %66, %5 : vector<8x128xf32>
    %68 = arith.mulf %54, %67 : vector<8x128xf32>
    %69 = arith.addf %65, %68 : vector<8x128xf32>
    %70 = math.tanh %69 : vector<8x128xf32>
    %71 = arith.subf %40, %70 : vector<8x128xf32>
    %72 = arith.mulf %64, %71 : vector<8x128xf32>
    %73 = arith.addf %70, %72 : vector<8x128xf32>
    %c2_i32 = arith.constant 2 : i32
    %74 = arith.index_cast %c2_i32 : i32 to index
    %c0_24 = arith.constant 0 : index
    %c0_25 = arith.constant 0 : index
    %75 = vector.load %arg1[%74, %c0_24, %c0_25] : memref<8x8x384xf32, #tpu.memory_space<vmem>>, vector<1x8x384xf32>
    %76 = vector.shape_cast %75 : vector<1x8x384xf32> to vector<8x384xf32>
    %cst_26 = arith.constant dense<0.000000e+00> : vector<8x384xf32>
    %77 = tpu.matmul %73, %6, %cst_26 {dimension_numbers = #tpu.dot_dimension_numbers<[1], [0], [0], [1], [0, 0, 1, 1], [], []>} : vector<8x128xf32>, vector<128x384xf32>, vector<8x384xf32> -> vector<8x384xf32>
    %78 = vector.extract_strided_slice %76 {offsets = [0, 0], sizes = [8, 128], strides = [1, 1]} : vector<8x384xf32> to vector<8x128xf32>
    %79 = vector.extract_strided_slice %77 {offsets = [0, 0], sizes = [8, 128], strides = [1, 1]} : vector<8x384xf32> to vector<8x128xf32>
    %80 = arith.addf %78, %79 : vector<8x128xf32>
    %cst_27 = arith.constant 5.000000e-01 : f32
    %81 = vector.broadcast %cst_27 : f32 to vector<8x128xf32>
    %82 = arith.mulf %81, %80 : vector<8x128xf32>
    %83 = math.tanh %82 : vector<8x128xf32>
    %cst_28 = arith.constant 5.000000e-01 : f32
    %84 = vector.broadcast %cst_28 : f32 to vector<8x128xf32>
    %85 = arith.mulf %84, %83 : vector<8x128xf32>
    %cst_29 = arith.constant 5.000000e-01 : f32
    %86 = vector.broadcast %cst_29 : f32 to vector<8x128xf32>
    %87 = arith.addf %85, %86 : vector<8x128xf32>
    %88 = vector.extract_strided_slice %76 {offsets = [0, 128], sizes = [8, 128], strides = [1, 1]} : vector<8x384xf32> to vector<8x128xf32>
    %89 = vector.extract_strided_slice %77 {offsets = [0, 128], sizes = [8, 128], strides = [1, 1]} : vector<8x384xf32> to vector<8x128xf32>
    %90 = arith.addf %88, %89 : vector<8x128xf32>
    %cst_30 = arith.constant 5.000000e-01 : f32
    %91 = vector.broadcast %cst_30 : f32 to vector<8x128xf32>
    %92 = arith.mulf %91, %90 : vector<8x128xf32>
    %93 = math.tanh %92 : vector<8x128xf32>
    %cst_31 = arith.constant 5.000000e-01 : f32
    %94 = vector.broadcast %cst_31 : f32 to vector<8x128xf32>
    %95 = arith.mulf %94, %93 : vector<8x128xf32>
    %cst_32 = arith.constant 5.000000e-01 : f32
    %96 = vector.broadcast %cst_32 : f32 to vector<8x128xf32>
    %97 = arith.addf %95, %96 : vector<8x128xf32>
    %98 = vector.extract_strided_slice %76 {offsets = [0, 256], sizes = [8, 128], strides = [1, 1]} : vector<8x384xf32> to vector<8x128xf32>
    %99 = vector.extract_strided_slice %77 {offsets = [0, 256], sizes = [8, 128], strides = [1, 1]} : vector<8x384xf32> to vector<8x128xf32>
    %100 = arith.addf %99, %5 : vector<8x128xf32>
    %101 = arith.mulf %87, %100 : vector<8x128xf32>
    %102 = arith.addf %98, %101 : vector<8x128xf32>
    %103 = math.tanh %102 : vector<8x128xf32>
    %104 = arith.subf %73, %103 : vector<8x128xf32>
    %105 = arith.mulf %97, %104 : vector<8x128xf32>
    %106 = arith.addf %103, %105 : vector<8x128xf32>
    %c3_i32 = arith.constant 3 : i32
    %107 = arith.index_cast %c3_i32 : i32 to index
    %c0_33 = arith.constant 0 : index
    %c0_34 = arith.constant 0 : index
    %108 = vector.load %arg1[%107, %c0_33, %c0_34] : memref<8x8x384xf32, #tpu.memory_space<vmem>>, vector<1x8x384xf32>
    %109 = vector.shape_cast %108 : vector<1x8x384xf32> to vector<8x384xf32>
    %cst_35 = arith.constant dense<0.000000e+00> : vector<8x384xf32>
    %110 = tpu.matmul %106, %6, %cst_35 {dimension_numbers = #tpu.dot_dimension_numbers<[1], [0], [0], [1], [0, 0, 1, 1], [], []>} : vector<8x128xf32>, vector<128x384xf32>, vector<8x384xf32> -> vector<8x384xf32>
    %111 = vector.extract_strided_slice %109 {offsets = [0, 0], sizes = [8, 128], strides = [1, 1]} : vector<8x384xf32> to vector<8x128xf32>
    %112 = vector.extract_strided_slice %110 {offsets = [0, 0], sizes = [8, 128], strides = [1, 1]} : vector<8x384xf32> to vector<8x128xf32>
    %113 = arith.addf %111, %112 : vector<8x128xf32>
    %cst_36 = arith.constant 5.000000e-01 : f32
    %114 = vector.broadcast %cst_36 : f32 to vector<8x128xf32>
    %115 = arith.mulf %114, %113 : vector<8x128xf32>
    %116 = math.tanh %115 : vector<8x128xf32>
    %cst_37 = arith.constant 5.000000e-01 : f32
    %117 = vector.broadcast %cst_37 : f32 to vector<8x128xf32>
    %118 = arith.mulf %117, %116 : vector<8x128xf32>
    %cst_38 = arith.constant 5.000000e-01 : f32
    %119 = vector.broadcast %cst_38 : f32 to vector<8x128xf32>
    %120 = arith.addf %118, %119 : vector<8x128xf32>
    %121 = vector.extract_strided_slice %109 {offsets = [0, 128], sizes = [8, 128], strides = [1, 1]} : vector<8x384xf32> to vector<8x128xf32>
    %122 = vector.extract_strided_slice %110 {offsets = [0, 128], sizes = [8, 128], strides = [1, 1]} : vector<8x384xf32> to vector<8x128xf32>
    %123 = arith.addf %121, %122 : vector<8x128xf32>
    %cst_39 = arith.constant 5.000000e-01 : f32
    %124 = vector.broadcast %cst_39 : f32 to vector<8x128xf32>
    %125 = arith.mulf %124, %123 : vector<8x128xf32>
    %126 = math.tanh %125 : vector<8x128xf32>
    %cst_40 = arith.constant 5.000000e-01 : f32
    %127 = vector.broadcast %cst_40 : f32 to vector<8x128xf32>
    %128 = arith.mulf %127, %126 : vector<8x128xf32>
    %cst_41 = arith.constant 5.000000e-01 : f32
    %129 = vector.broadcast %cst_41 : f32 to vector<8x128xf32>
    %130 = arith.addf %128, %129 : vector<8x128xf32>
    %131 = vector.extract_strided_slice %109 {offsets = [0, 256], sizes = [8, 128], strides = [1, 1]} : vector<8x384xf32> to vector<8x128xf32>
    %132 = vector.extract_strided_slice %110 {offsets = [0, 256], sizes = [8, 128], strides = [1, 1]} : vector<8x384xf32> to vector<8x128xf32>
    %133 = arith.addf %132, %5 : vector<8x128xf32>
    %134 = arith.mulf %120, %133 : vector<8x128xf32>
    %135 = arith.addf %131, %134 : vector<8x128xf32>
    %136 = math.tanh %135 : vector<8x128xf32>
    %137 = arith.subf %106, %136 : vector<8x128xf32>
    %138 = arith.mulf %130, %137 : vector<8x128xf32>
    %139 = arith.addf %136, %138 : vector<8x128xf32>
    %c4_i32 = arith.constant 4 : i32
    %140 = arith.index_cast %c4_i32 : i32 to index
    %c0_42 = arith.constant 0 : index
    %c0_43 = arith.constant 0 : index
    %141 = vector.load %arg1[%140, %c0_42, %c0_43] : memref<8x8x384xf32, #tpu.memory_space<vmem>>, vector<1x8x384xf32>
    %142 = vector.shape_cast %141 : vector<1x8x384xf32> to vector<8x384xf32>
    %cst_44 = arith.constant dense<0.000000e+00> : vector<8x384xf32>
    %143 = tpu.matmul %139, %6, %cst_44 {dimension_numbers = #tpu.dot_dimension_numbers<[1], [0], [0], [1], [0, 0, 1, 1], [], []>} : vector<8x128xf32>, vector<128x384xf32>, vector<8x384xf32> -> vector<8x384xf32>
    %144 = vector.extract_strided_slice %142 {offsets = [0, 0], sizes = [8, 128], strides = [1, 1]} : vector<8x384xf32> to vector<8x128xf32>
    %145 = vector.extract_strided_slice %143 {offsets = [0, 0], sizes = [8, 128], strides = [1, 1]} : vector<8x384xf32> to vector<8x128xf32>
    %146 = arith.addf %144, %145 : vector<8x128xf32>
    %cst_45 = arith.constant 5.000000e-01 : f32
    %147 = vector.broadcast %cst_45 : f32 to vector<8x128xf32>
    %148 = arith.mulf %147, %146 : vector<8x128xf32>
    %149 = math.tanh %148 : vector<8x128xf32>
    %cst_46 = arith.constant 5.000000e-01 : f32
    %150 = vector.broadcast %cst_46 : f32 to vector<8x128xf32>
    %151 = arith.mulf %150, %149 : vector<8x128xf32>
    %cst_47 = arith.constant 5.000000e-01 : f32
    %152 = vector.broadcast %cst_47 : f32 to vector<8x128xf32>
    %153 = arith.addf %151, %152 : vector<8x128xf32>
    %154 = vector.extract_strided_slice %142 {offsets = [0, 128], sizes = [8, 128], strides = [1, 1]} : vector<8x384xf32> to vector<8x128xf32>
    %155 = vector.extract_strided_slice %143 {offsets = [0, 128], sizes = [8, 128], strides = [1, 1]} : vector<8x384xf32> to vector<8x128xf32>
    %156 = arith.addf %154, %155 : vector<8x128xf32>
    %cst_48 = arith.constant 5.000000e-01 : f32
    %157 = vector.broadcast %cst_48 : f32 to vector<8x128xf32>
    %158 = arith.mulf %157, %156 : vector<8x128xf32>
    %159 = math.tanh %158 : vector<8x128xf32>
    %cst_49 = arith.constant 5.000000e-01 : f32
    %160 = vector.broadcast %cst_49 : f32 to vector<8x128xf32>
    %161 = arith.mulf %160, %159 : vector<8x128xf32>
    %cst_50 = arith.constant 5.000000e-01 : f32
    %162 = vector.broadcast %cst_50 : f32 to vector<8x128xf32>
    %163 = arith.addf %161, %162 : vector<8x128xf32>
    %164 = vector.extract_strided_slice %142 {offsets = [0, 256], sizes = [8, 128], strides = [1, 1]} : vector<8x384xf32> to vector<8x128xf32>
    %165 = vector.extract_strided_slice %143 {offsets = [0, 256], sizes = [8, 128], strides = [1, 1]} : vector<8x384xf32> to vector<8x128xf32>
    %166 = arith.addf %165, %5 : vector<8x128xf32>
    %167 = arith.mulf %153, %166 : vector<8x128xf32>
    %168 = arith.addf %164, %167 : vector<8x128xf32>
    %169 = math.tanh %168 : vector<8x128xf32>
    %170 = arith.subf %139, %169 : vector<8x128xf32>
    %171 = arith.mulf %163, %170 : vector<8x128xf32>
    %172 = arith.addf %169, %171 : vector<8x128xf32>
    %c5_i32 = arith.constant 5 : i32
    %173 = arith.index_cast %c5_i32 : i32 to index
    %c0_51 = arith.constant 0 : index
    %c0_52 = arith.constant 0 : index
    %174 = vector.load %arg1[%173, %c0_51, %c0_52] : memref<8x8x384xf32, #tpu.memory_space<vmem>>, vector<1x8x384xf32>
    %175 = vector.shape_cast %174 : vector<1x8x384xf32> to vector<8x384xf32>
    %cst_53 = arith.constant dense<0.000000e+00> : vector<8x384xf32>
    %176 = tpu.matmul %172, %6, %cst_53 {dimension_numbers = #tpu.dot_dimension_numbers<[1], [0], [0], [1], [0, 0, 1, 1], [], []>} : vector<8x128xf32>, vector<128x384xf32>, vector<8x384xf32> -> vector<8x384xf32>
    %177 = vector.extract_strided_slice %175 {offsets = [0, 0], sizes = [8, 128], strides = [1, 1]} : vector<8x384xf32> to vector<8x128xf32>
    %178 = vector.extract_strided_slice %176 {offsets = [0, 0], sizes = [8, 128], strides = [1, 1]} : vector<8x384xf32> to vector<8x128xf32>
    %179 = arith.addf %177, %178 : vector<8x128xf32>
    %cst_54 = arith.constant 5.000000e-01 : f32
    %180 = vector.broadcast %cst_54 : f32 to vector<8x128xf32>
    %181 = arith.mulf %180, %179 : vector<8x128xf32>
    %182 = math.tanh %181 : vector<8x128xf32>
    %cst_55 = arith.constant 5.000000e-01 : f32
    %183 = vector.broadcast %cst_55 : f32 to vector<8x128xf32>
    %184 = arith.mulf %183, %182 : vector<8x128xf32>
    %cst_56 = arith.constant 5.000000e-01 : f32
    %185 = vector.broadcast %cst_56 : f32 to vector<8x128xf32>
    %186 = arith.addf %184, %185 : vector<8x128xf32>
    %187 = vector.extract_strided_slice %175 {offsets = [0, 128], sizes = [8, 128], strides = [1, 1]} : vector<8x384xf32> to vector<8x128xf32>
    %188 = vector.extract_strided_slice %176 {offsets = [0, 128], sizes = [8, 128], strides = [1, 1]} : vector<8x384xf32> to vector<8x128xf32>
    %189 = arith.addf %187, %188 : vector<8x128xf32>
    %cst_57 = arith.constant 5.000000e-01 : f32
    %190 = vector.broadcast %cst_57 : f32 to vector<8x128xf32>
    %191 = arith.mulf %190, %189 : vector<8x128xf32>
    %192 = math.tanh %191 : vector<8x128xf32>
    %cst_58 = arith.constant 5.000000e-01 : f32
    %193 = vector.broadcast %cst_58 : f32 to vector<8x128xf32>
    %194 = arith.mulf %193, %192 : vector<8x128xf32>
    %cst_59 = arith.constant 5.000000e-01 : f32
    %195 = vector.broadcast %cst_59 : f32 to vector<8x128xf32>
    %196 = arith.addf %194, %195 : vector<8x128xf32>
    %197 = vector.extract_strided_slice %175 {offsets = [0, 256], sizes = [8, 128], strides = [1, 1]} : vector<8x384xf32> to vector<8x128xf32>
    %198 = vector.extract_strided_slice %176 {offsets = [0, 256], sizes = [8, 128], strides = [1, 1]} : vector<8x384xf32> to vector<8x128xf32>
    %199 = arith.addf %198, %5 : vector<8x128xf32>
    %200 = arith.mulf %186, %199 : vector<8x128xf32>
    %201 = arith.addf %197, %200 : vector<8x128xf32>
    %202 = math.tanh %201 : vector<8x128xf32>
    %203 = arith.subf %172, %202 : vector<8x128xf32>
    %204 = arith.mulf %196, %203 : vector<8x128xf32>
    %205 = arith.addf %202, %204 : vector<8x128xf32>
    %c6_i32 = arith.constant 6 : i32
    %206 = arith.index_cast %c6_i32 : i32 to index
    %c0_60 = arith.constant 0 : index
    %c0_61 = arith.constant 0 : index
    %207 = vector.load %arg1[%206, %c0_60, %c0_61] : memref<8x8x384xf32, #tpu.memory_space<vmem>>, vector<1x8x384xf32>
    %208 = vector.shape_cast %207 : vector<1x8x384xf32> to vector<8x384xf32>
    %cst_62 = arith.constant dense<0.000000e+00> : vector<8x384xf32>
    %209 = tpu.matmul %205, %6, %cst_62 {dimension_numbers = #tpu.dot_dimension_numbers<[1], [0], [0], [1], [0, 0, 1, 1], [], []>} : vector<8x128xf32>, vector<128x384xf32>, vector<8x384xf32> -> vector<8x384xf32>
    %210 = vector.extract_strided_slice %208 {offsets = [0, 0], sizes = [8, 128], strides = [1, 1]} : vector<8x384xf32> to vector<8x128xf32>
    %211 = vector.extract_strided_slice %209 {offsets = [0, 0], sizes = [8, 128], strides = [1, 1]} : vector<8x384xf32> to vector<8x128xf32>
    %212 = arith.addf %210, %211 : vector<8x128xf32>
    %cst_63 = arith.constant 5.000000e-01 : f32
    %213 = vector.broadcast %cst_63 : f32 to vector<8x128xf32>
    %214 = arith.mulf %213, %212 : vector<8x128xf32>
    %215 = math.tanh %214 : vector<8x128xf32>
    %cst_64 = arith.constant 5.000000e-01 : f32
    %216 = vector.broadcast %cst_64 : f32 to vector<8x128xf32>
    %217 = arith.mulf %216, %215 : vector<8x128xf32>
    %cst_65 = arith.constant 5.000000e-01 : f32
    %218 = vector.broadcast %cst_65 : f32 to vector<8x128xf32>
    %219 = arith.addf %217, %218 : vector<8x128xf32>
    %220 = vector.extract_strided_slice %208 {offsets = [0, 128], sizes = [8, 128], strides = [1, 1]} : vector<8x384xf32> to vector<8x128xf32>
    %221 = vector.extract_strided_slice %209 {offsets = [0, 128], sizes = [8, 128], strides = [1, 1]} : vector<8x384xf32> to vector<8x128xf32>
    %222 = arith.addf %220, %221 : vector<8x128xf32>
    %cst_66 = arith.constant 5.000000e-01 : f32
    %223 = vector.broadcast %cst_66 : f32 to vector<8x128xf32>
    %224 = arith.mulf %223, %222 : vector<8x128xf32>
    %225 = math.tanh %224 : vector<8x128xf32>
    %cst_67 = arith.constant 5.000000e-01 : f32
    %226 = vector.broadcast %cst_67 : f32 to vector<8x128xf32>
    %227 = arith.mulf %226, %225 : vector<8x128xf32>
    %cst_68 = arith.constant 5.000000e-01 : f32
    %228 = vector.broadcast %cst_68 : f32 to vector<8x128xf32>
    %229 = arith.addf %227, %228 : vector<8x128xf32>
    %230 = vector.extract_strided_slice %208 {offsets = [0, 256], sizes = [8, 128], strides = [1, 1]} : vector<8x384xf32> to vector<8x128xf32>
    %231 = vector.extract_strided_slice %209 {offsets = [0, 256], sizes = [8, 128], strides = [1, 1]} : vector<8x384xf32> to vector<8x128xf32>
    %232 = arith.addf %231, %5 : vector<8x128xf32>
    %233 = arith.mulf %219, %232 : vector<8x128xf32>
    %234 = arith.addf %230, %233 : vector<8x128xf32>
    %235 = math.tanh %234 : vector<8x128xf32>
    %236 = arith.subf %205, %235 : vector<8x128xf32>
    %237 = arith.mulf %229, %236 : vector<8x128xf32>
    %238 = arith.addf %235, %237 : vector<8x128xf32>
    %c7_i32 = arith.constant 7 : i32
    %239 = arith.index_cast %c7_i32 : i32 to index
    %c0_69 = arith.constant 0 : index
    %c0_70 = arith.constant 0 : index
    %240 = vector.load %arg1[%239, %c0_69, %c0_70] : memref<8x8x384xf32, #tpu.memory_space<vmem>>, vector<1x8x384xf32>
    %241 = vector.shape_cast %240 : vector<1x8x384xf32> to vector<8x384xf32>
    %cst_71 = arith.constant dense<0.000000e+00> : vector<8x384xf32>
    %242 = tpu.matmul %238, %6, %cst_71 {dimension_numbers = #tpu.dot_dimension_numbers<[1], [0], [0], [1], [0, 0, 1, 1], [], []>} : vector<8x128xf32>, vector<128x384xf32>, vector<8x384xf32> -> vector<8x384xf32>
    %243 = vector.extract_strided_slice %241 {offsets = [0, 0], sizes = [8, 128], strides = [1, 1]} : vector<8x384xf32> to vector<8x128xf32>
    %244 = vector.extract_strided_slice %242 {offsets = [0, 0], sizes = [8, 128], strides = [1, 1]} : vector<8x384xf32> to vector<8x128xf32>
    %245 = arith.addf %243, %244 : vector<8x128xf32>
    %cst_72 = arith.constant 5.000000e-01 : f32
    %246 = vector.broadcast %cst_72 : f32 to vector<8x128xf32>
    %247 = arith.mulf %246, %245 : vector<8x128xf32>
    %248 = math.tanh %247 : vector<8x128xf32>
    %cst_73 = arith.constant 5.000000e-01 : f32
    %249 = vector.broadcast %cst_73 : f32 to vector<8x128xf32>
    %250 = arith.mulf %249, %248 : vector<8x128xf32>
    %cst_74 = arith.constant 5.000000e-01 : f32
    %251 = vector.broadcast %cst_74 : f32 to vector<8x128xf32>
    %252 = arith.addf %250, %251 : vector<8x128xf32>
    %253 = vector.extract_strided_slice %241 {offsets = [0, 128], sizes = [8, 128], strides = [1, 1]} : vector<8x384xf32> to vector<8x128xf32>
    %254 = vector.extract_strided_slice %242 {offsets = [0, 128], sizes = [8, 128], strides = [1, 1]} : vector<8x384xf32> to vector<8x128xf32>
    %255 = arith.addf %253, %254 : vector<8x128xf32>
    %cst_75 = arith.constant 5.000000e-01 : f32
    %256 = vector.broadcast %cst_75 : f32 to vector<8x128xf32>
    %257 = arith.mulf %256, %255 : vector<8x128xf32>
    %258 = math.tanh %257 : vector<8x128xf32>
    %cst_76 = arith.constant 5.000000e-01 : f32
    %259 = vector.broadcast %cst_76 : f32 to vector<8x128xf32>
    %260 = arith.mulf %259, %258 : vector<8x128xf32>
    %cst_77 = arith.constant 5.000000e-01 : f32
    %261 = vector.broadcast %cst_77 : f32 to vector<8x128xf32>
    %262 = arith.addf %260, %261 : vector<8x128xf32>
    %263 = vector.extract_strided_slice %241 {offsets = [0, 256], sizes = [8, 128], strides = [1, 1]} : vector<8x384xf32> to vector<8x128xf32>
    %264 = vector.extract_strided_slice %242 {offsets = [0, 256], sizes = [8, 128], strides = [1, 1]} : vector<8x384xf32> to vector<8x128xf32>
    %265 = arith.addf %264, %5 : vector<8x128xf32>
    %266 = arith.mulf %252, %265 : vector<8x128xf32>
    %267 = arith.addf %263, %266 : vector<8x128xf32>
    %268 = math.tanh %267 : vector<8x128xf32>
    %269 = arith.subf %238, %268 : vector<8x128xf32>
    %270 = arith.mulf %262, %269 : vector<8x128xf32>
    %271 = arith.addf %268, %270 : vector<8x128xf32>
    %c8_i32 = arith.constant 8 : i32
    %c0_78 = arith.constant 0 : index
    %c0_79 = arith.constant 0 : index
    %272 = vector.load %arg4[%c0_78, %c0_79] : memref<8x128xf32, #tpu.memory_space<vmem>>, vector<8x128xf32>
    tpu.vector_store %arg4[%c0_78, %c0_79], %271 {strides = array<i32>} : memref<8x128xf32, #tpu.memory_space<vmem>>, vector<8x128xf32>,
    return
  }
  func.func @transform_0(%arg0: i32) -> (i32, i32, i32) {
    %c0_i32 = arith.constant 0 : i32
    %c0_i32_0 = arith.constant 0 : i32
    %c0_i32_1 = arith.constant 0 : i32
    return %arg0, %c0_i32, %c0_i32_0 : i32, i32, i32
  }
  func.func @transform_1(%arg0: i32) -> (i32, i32) {
    %c0_i32 = arith.constant 0 : i32
    %c0_i32_0 = arith.constant 0 : i32
    %c0_i32_1 = arith.constant 0 : i32
    return %c0_i32, %c0_i32_0 : i32, i32
  }
  func.func @transform_2(%arg0: i32) -> (i32, i32) {
    %c0_i32 = arith.constant 0 : i32
    %c0_i32_0 = arith.constant 0 : i32
    %c0_i32_1 = arith.constant 0 : i32
    return %c0_i32, %c0_i32_0 : i32, i32
  }
  func.func @transform_3(%arg0: i32) -> (i32, i32) {
    %c0_i32 = arith.constant 0 : i32
    %c0_i32_0 = arith.constant 0 : i32
    %c0_i32_1 = arith.constant 0 : i32
    return %c0_i32, %c0_i32_0 : i32, i32
  }
}

</mosaic_0001>

<bundles_post_ra>
// kernel: gru_forward.1
= control target key start
LH: loop header
LB: loop body
LE: loop exit
PB: predicated region body
PF: predicated region fallthrough
CT: control target
= control target key end

     0   :  { %v2312_v3 = vmov 0.0|0.0   ;;  %v2313_v4 = vmov 0.0   ;;  %vm2314_vm0 = vmmov 0   ;;  %s2922_s1 = inlined_call_operand.vmem [shape: f32[128,384], index: 1, kind: input, shape index: {}]   ;;  %s2923_s0 = inlined_call_operand.vmem [shape: f32[8,8,384], index: 0, kind: input, shape index: {}]   ;;  %s2924_s2 = inlined_call_operand.vmem [shape: f32[1,128], index: 2, kind: input, shape index: {}]   ;;  %s2925_s3 = inlined_call_operand.vmem [shape: f32[8,128], index: 3, kind: output, shape index: {}]  }
   0x1   :  { %v27_v0 = vld [vmem:[%s2922_s1 + $0x8] sm:$0xff]  ;;  %v30_v1 = vld [vmem:[%s2922_s1 + $0x20] sm:$0xff]  ;;  %1845 = vmatprep.subr.bf16.mxu1 %v2312_v3  ;;  %142 = vmatprep.mubr.f32.mxu0 %v2313_v4  ;;  %v29_v6 = vld [vmem:[%s2922_s1 + $0x18] sm:$0xff] }
   0x2   :  { %v26_v2 = vld [vmem:[%s2922_s1] sm:$0xff]  ;;  %v2346_v5 = vpack.c.bf16 %v30_v1, %v27_v0  ;;  %v33_v7 = vld [vmem:[%s2922_s1 + $0x38] sm:$0xff]  ;;  %v36_v8 = vld [vmem:[%s2922_s1 + $0x50] sm:$0xff]  ;;  %1565 = vmatprep.mubr.msk.f32.mxu1 %vm2314_vm0, %v2313_v4 }
   0x3   :  { %v2359_v9 = vpack.c.bf16 %v29_v6, %v26_v2  ;;  %v2361_v10 = vpack.c.bf16 %v36_v8, %v33_v7  ;;  %v32_v11 = vld [vmem:[%s2922_s1 + $0x30] sm:$0xff]  ;;  %v35_v12 = vld [vmem:[%s2922_s1 + $0x48] sm:$0xff]  ;;  %v42_v14 = vld [vmem:[%s2922_s1 + $0x80] sm:$0xff] }
   0x4   :  { %v39_v13 = vld [vmem:[%s2922_s1 + $0x68] sm:$0xff]  ;;  %1814 = vmatprep.subr.bf16.mxu0 %v2346_v5  ;;  %v2377_v15 = vpack.c.bf16 %v35_v12, %v32_v11  ;;  %v38_v17 = vld [vmem:[%s2922_s1 + $0x60] sm:$0xff]  ;;  %v41_v18 = vld [vmem:[%s2922_s1 + $0x78] sm:$0xff] }
   0x5   :  { %1816 = vmatpush1.bf16.msra.mxu0 %v2359_v9  ;;  %v2380_v16 = vpack.c.bf16 %v42_v14, %v39_v13  ;;  %v45_v19 = vld [vmem:[%s2922_s1 + $0x98] sm:$0xff]  ;;  %v48_v20 = vld [vmem:[%s2922_s1 + $0xb0] sm:$0xff]  ;;  %v31_v22 = vld [vmem:[%s2922_s1 + $0x28] sm:$0xff]  ;;  %v2401_v23 = vpack.c.bf16 %v41_v18, %v38_v17 }
   0x6   :  { %1818 = vmatprep.subr.bf16.mxu0 %v2361_v10  ;;  %v28_v21 = vld [vmem:[%s2922_s1 + $0x10] sm:$0xff]  ;;  %v34_v25 = vld [vmem:[%s2922_s1 + $0x40] sm:$0xff]  ;;  %v2409_v26 = vpack.c.bf16 %v48_v20, %v45_v19  ;;  %v47_v28 = vld [vmem:[%s2922_s1 + $0xa8] sm:$0xff] }
   0x7   :  { %v2403_v24 = vpack.c.bf16 %v31_v22, %v28_v21  ;;  %v44_v27 = vld [vmem:[%s2922_s1 + $0x90] sm:$0xff]  ;;  %v37_v29 = vld [vmem:[%s2922_s1 + $0x58] sm:$0xff]  ;;  %v51_v30 = vld [vmem:[%s2922_s1 + $0xc8] sm:$0xff] }
   0x8   :  { %v54_v31 = vld [vmem:[%s2922_s1 + $0xe0] sm:$0xff]  ;;  %v2427_v32 = vpack.c.bf16 %v37_v29, %v34_v25  ;;  %v40_v33 = vld [vmem:[%s2922_s1 + $0x70] sm:$0xff]  ;;  %v43_v34 = vld [vmem:[%s2922_s1 + $0x88] sm:$0xff]  ;;  %v2437_v35 = vpack.c.bf16 %v47_v28, %v44_v27 }
   0x9   :  { %1820 = vmatpush1.bf16.msra.mxu0 %v2377_v15  ;;  %1847 = vmatpush3.bf16.msra.mxu1 %v2403_v24  ;;  %v2440_v36 = vpack.c.bf16 %v54_v31, %v51_v30  ;;  %v50_v37 = vld [vmem:[%s2922_s1 + $0xc0] sm:$0xff]  ;;  %v53_v38 = vld [vmem:[%s2922_s1 + $0xd8] sm:$0xff]  ;;  %v60_v40 = vld [vmem:[%s2922_s1 + $0x110] sm:$0xff]  ;;  %v2455_v41 = vpack.c.bf16 %v43_v34, %v40_v33 }
   0xa   :  { %1822 = vmatprep.subr.bf16.mxu0 %v2380_v16  ;;  %1848 = vmatprep.subr.bf16.mxu1 %v2312_v3  ;;  %v57_v39 = vld [vmem:[%s2922_s1 + $0xf8] sm:$0xff]  ;;  %v46_v42 = vld [vmem:[%s2922_s1 + $0xa0] sm:$0xff]  ;;  %v2465_v44 = vpack.c.bf16 %v53_v38, %v50_v37  ;;  %v56_v46 = vld [vmem:[%s2922_s1 + $0xf0] sm:$0xff] }
   0xb   :  { %v49_v43 = vld [vmem:[%s2922_s1 + $0xb8] sm:$0xff]  ;;  %v2468_v45 = vpack.c.bf16 %v60_v40, %v57_v39  ;;  %v59_v47 = vld [vmem:[%s2922_s1 + $0x108] sm:$0xff]  ;;  %v66_v49 = vld [vmem:[%s2922_s1 + $0x140] sm:$0xff] }
   0xc   :  { %v63_v48 = vld [vmem:[%s2922_s1 + $0x128] sm:$0xff]  ;;  %v2483_v50 = vpack.c.bf16 %v49_v43, %v46_v42  ;;  %v52_v51 = vld [vmem:[%s2922_s1 + $0xd0] sm:$0xff]  ;;  %v2493_v53 = vpack.c.bf16 %v59_v47, %v56_v46  ;;  %v62_v55 = vld [vmem:[%s2922_s1 + $0x120] sm:$0xff] }
   0xd   :  { %1824 = vmatpush1.bf16.msra.mxu0 %v2401_v23  ;;  %1850 = vmatpush3.bf16.msra.mxu1 %v2427_v32  ;;  %v55_v52 = vld [vmem:[%s2922_s1 + $0xe8] sm:$0xff]  ;;  %v2496_v54 = vpack.c.bf16 %v66_v49, %v63_v48  ;;  %v65_v56 = vld [vmem:[%s2922_s1 + $0x138] sm:$0xff]  ;;  %v72_v58 = vld [vmem:[%s2922_s1 + $0x170] sm:$0xff] }
   0xe   :  { %1826 = vmatprep.subr.bf16.mxu0 %v2409_v26  ;;  %1851 = vmatprep.subr.bf16.mxu1 %v2312_v3  ;;  %v69_v57 = vld [vmem:[%s2922_s1 + $0x158] sm:$0xff]  ;;  %v2511_v59 = vpack.c.bf16 %v55_v52, %v52_v51  ;;  %v58_v60 = vld [vmem:[%s2922_s1 + $0x100] sm:$0xff]  ;;  %v2521_v62 = vpack.c.bf16 %v65_v56, %v62_v55  ;;  %v68_v0 = vld [vmem:[%s2922_s1 + $0x150] sm:$0xff] }
   0xf   :  { %v61_v61 = vld [vmem:[%s2922_s1 + $0x118] sm:$0xff]  ;;  %v2524_v63 = vpack.c.bf16 %v72_v58, %v69_v57  ;;  %v71_v1 = vld [vmem:[%s2922_s1 + $0x168] sm:$0xff]  ;;  %v64_v6 = vld [vmem:[%s2922_s1 + $0x130] sm:$0xff] }
  0x10   :  { %v2533_v2 = vpack.c.bf16 %v61_v61, %v58_v60  ;;  %v67_v7 = vld [vmem:[%s2922_s1 + $0x148] sm:$0xff]  ;;  %v2543_v8 = vpack.c.bf16 %v71_v1, %v68_v0  ;;  %v70_v12 = vld [vmem:[%s2922_s1 + $0x160] sm:$0xff]  ;;  %v73_v13 = vld [vmem:[%s2922_s1 + $0x178] sm:$0xff] }
  0x11   :  { %1828 = vmatpush1.bf16.msra.mxu0 %v2437_v35  ;;  %1853 = vmatpush3.bf16.msra.mxu1 %v2455_v41  ;;  %v2547_v11 = vpack.c.bf16 %v67_v7, %v64_v6  ;;  %v2559_v14 = vpack.c.bf16 %v73_v13, %v70_v12  ;;  %v75_v17 = vld [vmem:[%s2923_s0] sm:$0xff]  ;;  %v76_v25 = vld [vmem:[%s2923_s0 + $0x8] sm:$0xff]  ;;  %v77_v38 = vld [vmem:[%s2923_s0 + $0x10] sm:$0xff] }
  0x12   :  { %1830 = vmatprep.subr.bf16.mxu0 %v2440_v36  ;;  %1854 = vmatprep.subr.bf16.mxu1 %v2312_v3  ;;  %v2610_v29 = vld [vmem:[%s2924_s2] ss:$0 sm:$0xff]  ;;  %v1376_v52 = vld [vmem:[%s2923_s0 + $0x18] sm:$0xff] }
  0x13   :  { %v1377_v0 = vld [vmem:[%s2923_s0 + $0x20] sm:$0xff] }
  0x15   :  { %1832 = vmatpush1.bf16.msra.mxu0 %v2465_v44  ;;  %1856 = vmatpush3.bf16.msra.mxu1 %v2483_v50 }
  0x16   :  { %1834 = vmatprep.subr.bf16.mxu0 %v2468_v45  ;;  %1857 = vmatprep.subr.bf16.mxu1 %v2312_v3 }
  0x19   :  { %1836 = vmatpush1.bf16.msra.mxu0 %v2493_v53  ;;  %1859 = vmatpush3.bf16.msra.mxu1 %v2511_v59 }
  0x1a   :  { %1838 = vmatprep.subr.bf16.mxu0 %v2496_v54  ;;  %1860 = vmatprep.subr.bf16.mxu1 %v2312_v3 }
  0x1d   :  { %1840 = vmatpush1.bf16.msra.mxu0 %v2521_v62  ;;  %1862 = vmatpush3.bf16.msra.mxu1 %v2533_v2 }
  0x1e   :  { %1842 = vmatprep.subr.bf16.mxu0 %v2524_v63  ;;  %1863 = vmatprep.subr.bf16.mxu1 %v2312_v3 }
  0x21   :  { %1844 = vmatpush1.bf16.msra.mxu0 %v2543_v8  ;;  %1865 = vmatpush3.bf16.msra.mxu1 %v2547_v11 }
  0x22   :  { %1870 = vmatprep.subr.bf16.mxu0 %v2346_v5  ;;  %1866 = vmatprep.subr.bf16.mxu1 %v2312_v3 }
  0x24   :  { %143 = vmatmul.mubr.f32.vlgmr.msra.gmra.mrb[0].mxu0 %v2313_v4 }
  0x25   :  { %1872 = vmatpush1.bf16.msra.mxu0 %v2359_v9  ;;  %304 = vmatprep.mubr.f32.mxu0 %v2313_v4 }
  0x26   :  { %1874 = vmatprep.subr.bf16.mxu0 %v2361_v10  ;;  %1868 = vmatpush3.bf16.msra.mxu1 %v2559_v14 }
  0x27   :  { %1901 = vmatprep.subr.bf16.mxu1 %v2312_v3 }
  0x29   :  { %1876 = vmatpush1.bf16.msra.mxu0 %v2377_v15  ;;  %1566 = vmatmul.mubr.f32.vlgmr.msra.gmra.mrb[0].mxu1 %v2313_v4 }
  0x2a   :  { %1878 = vmatprep.subr.bf16.mxu0 %v2380_v16  ;;  %1903 = vmatpush3.bf16.msra.mxu1 %v2403_v24 }
  0x2b   :  { %1600 = vmatprep.mubr.msk.f32.mxu1 %vm2314_vm0, %v2313_v4  ;;  %1904 = vmatprep.subr.bf16.mxu1 %v2312_v3 }
  0x2d   :  { %1880 = vmatpush1.bf16.msra.mxu0 %v2401_v23 }
  0x2e   :  { %1882 = vmatprep.subr.bf16.mxu0 %v2409_v26  ;;  %1906 = vmatpush3.bf16.msra.mxu1 %v2427_v32 }
  0x2f   :  { %1907 = vmatprep.subr.bf16.mxu1 %v2312_v3 }
  0x31   :  { %1884 = vmatpush1.bf16.msra.mxu0 %v2437_v35 }
  0x32   :  { %1886 = vmatprep.subr.bf16.mxu0 %v2440_v36  ;;  %1909 = vmatpush3.bf16.msra.mxu1 %v2455_v41 }
  0x33   :  { %1910 = vmatprep.subr.bf16.mxu1 %v2312_v3 }
  0x35   :  { %1888 = vmatpush1.bf16.msra.mxu0 %v2465_v44 }
  0x36   :  { %1890 = vmatprep.subr.bf16.mxu0 %v2468_v45  ;;  %1912 = vmatpush3.bf16.msra.mxu1 %v2483_v50 }
  0x37   :  { %1913 = vmatprep.subr.bf16.mxu1 %v2312_v3 }
  0x39   :  { %1892 = vmatpush1.bf16.msra.mxu0 %v2493_v53 }
  0x3a   :  { %1894 = vmatprep.subr.bf16.mxu0 %v2496_v54  ;;  %1915 = vmatpush3.bf16.msra.mxu1 %v2511_v59 }
  0x3b   :  { %1916 = vmatprep.subr.bf16.mxu1 %v2312_v3 }
  0x3d   :  { %1896 = vmatpush1.bf16.msra.mxu0 %v2521_v62 }
  0x3e   :  { %1898 = vmatprep.subr.bf16.mxu0 %v2524_v63  ;;  %1918 = vmatpush3.bf16.msra.mxu1 %v2533_v2 }
  0x3f   :  { %1919 = vmatprep.subr.bf16.mxu1 %v2312_v3 }
  0x41   :  { %1900 = vmatpush1.bf16.msra.mxu0 %v2543_v8 }
  0x42   :  { %1926 = vmatprep.subr.bf16.mxu0 %v2346_v5  ;;  %1921 = vmatpush3.bf16.msra.mxu1 %v2547_v11 }
  0x43   :  { %1922 = vmatprep.subr.bf16.mxu1 %v2312_v3 }
  0x46   :  { %1924 = vmatpush3.bf16.msra.mxu1 %v2559_v14 }
  0x47   :  { %1957 = vmatprep.subr.bf16.mxu1 %v2312_v3 }
  0xf7   :  { %v144_v18 = vpop.f32.mrb[0].mxu0 }
  0xf8   :  { %v219_v19 = vadd.f32 %v144_v18, %v75_v17  ;;  %v146_v20 = vpop.f32.mrb[1].mxu0  ;;  %v1378_v18 = vld [vmem:[%s2923_s0 + $0x28] sm:$0xff] }
  0xf9   :  { %v224_v28 = vadd.f32 %v146_v20, %v76_v25 }
  0xfa   :  { %v220_v21 = vmul.f32 0.5, %v219_v19 }
  0xfb   :  { %v225_v30 = vmul.f32 0.5, %v224_v28 }
  0xfc   :  { %2264 = vtanh.f32 %v220_v21  ;;  %v215_v22 = vpop.f32.mrb[0].mxu1 }
  0xfd   :  { %v1567_v27 = vpop.f32.mrb[1].mxu1  ;;  %v229_v34 = vadd.f32 %v2610_v29, %v215_v22  ;;  %2266 = vtanh.f32 %v225_v30 }
 0x106   :  { %v2265_v31 = vpop.eup %2264 }
 0x107   :  { %v222_v33 = vmul.f32 0.5, %v2265_v31  ;;  %v2267_v42 = vpop.eup %2266 }
 0x108   :  { %v227_v43 = vmul.f32 0.5, %v2267_v42 }
 0x109   :  { %v223_v37 = vadd.f32 0.5, %v222_v33  ;;  %v1379_v33 = vld [vmem:[%s2923_s0 + $0x30] sm:$0xff] }
 0x10a   :  { %v228_v47 = vadd.f32 0.5, %v227_v43  ;;  %v1380_v43 = vld [vmem:[%s2923_s0 + $0x38] sm:$0xff] }
 0x10b   :  { %v230_v39 = vmul.f32 %v229_v34, %v223_v37 }
 0x10d   :  { %v231_v40 = vadd.f32 %v230_v39, %v77_v38 }
 0x10f   :  { %2268 = vtanh.f32 %v231_v40 }
 0x119   :  { %v2269_v46 = vpop.eup %2268 }
 0x11a   :  { %v233_v48 = vsub.f32 0.0, %v2269_v46 }
 0x11c   :  { %v234_v49 = vmul.f32 %v233_v48, %v228_v47 }
 0x11e   :  { %v2616_v51 = vadd.f32 %v2269_v46, %v234_v49 }
 0x120   :  { %305 = vmatmul.mubr.f32.vlgmr.msra.gmra.mrb[2].mxu0 %v2616_v51  ;;  %1601 = vmatmul.mubr.f32.vlgmr.msra.gmra.mrb[2].mxu1 %v2616_v51 }
 0x121   :  { %1928 = vmatpush1.bf16.msra.mxu0 %v2359_v9  ;;  %1959 = vmatpush3.bf16.msra.mxu1 %v2403_v24 }
 0x122   :  { %1930 = vmatprep.subr.bf16.mxu0 %v2361_v10  ;;  %1960 = vmatprep.subr.bf16.mxu1 %v2312_v3 }
 0x123   :  { %466 = vmatprep.mubr.f32.mxu0 %v2313_v4  ;;  %1635 = vmatprep.mubr.msk.f32.mxu1 %vm2314_vm0, %v2313_v4 }
 0x125   :  { %1932 = vmatpush1.bf16.msra.mxu0 %v2377_v15  ;;  %1962 = vmatpush3.bf16.msra.mxu1 %v2427_v32 }
 0x126   :  { %1934 = vmatprep.subr.bf16.mxu0 %v2380_v16  ;;  %1963 = vmatprep.subr.bf16.mxu1 %v2312_v3 }
 0x129   :  { %1936 = vmatpush1.bf16.msra.mxu0 %v2401_v23  ;;  %1965 = vmatpush3.bf16.msra.mxu1 %v2455_v41 }
 0x12a   :  { %1938 = vmatprep.subr.bf16.mxu0 %v2409_v26  ;;  %1966 = vmatprep.subr.bf16.mxu1 %v2312_v3 }
 0x12d   :  { %1940 = vmatpush1.bf16.msra.mxu0 %v2437_v35  ;;  %1968 = vmatpush3.bf16.msra.mxu1 %v2483_v50 }
 0x12e   :  { %1942 = vmatprep.subr.bf16.mxu0 %v2440_v36  ;;  %1969 = vmatprep.subr.bf16.mxu1 %v2312_v3 }
 0x131   :  { %1944 = vmatpush1.bf16.msra.mxu0 %v2465_v44  ;;  %1971 = vmatpush3.bf16.msra.mxu1 %v2511_v59 }
 0x132   :  { %1946 = vmatprep.subr.bf16.mxu0 %v2468_v45  ;;  %1972 = vmatprep.subr.bf16.mxu1 %v2312_v3 }
 0x135   :  { %1948 = vmatpush1.bf16.msra.mxu0 %v2493_v53  ;;  %1974 = vmatpush3.bf16.msra.mxu1 %v2533_v2 }
 0x136   :  { %1950 = vmatprep.subr.bf16.mxu0 %v2496_v54  ;;  %1975 = vmatprep.subr.bf16.mxu1 %v2312_v3 }
 0x139   :  { %1952 = vmatpush1.bf16.msra.mxu0 %v2521_v62  ;;  %1977 = vmatpush3.bf16.msra.mxu1 %v2547_v11 }
 0x13a   :  { %1954 = vmatprep.subr.bf16.mxu0 %v2524_v63  ;;  %1978 = vmatprep.subr.bf16.mxu1 %v2312_v3 }
 0x13d   :  { %1956 = vmatpush1.bf16.msra.mxu0 %v2543_v8  ;;  %1980 = vmatpush3.bf16.msra.mxu1 %v2559_v14 }
 0x13e   :  { %1982 = vmatprep.subr.bf16.mxu0 %v2346_v5  ;;  %2013 = vmatprep.subr.bf16.mxu1 %v2312_v3 }
 0x1f3   :  { %v306_v55 = vpop.f32.mrb[2].mxu0  ;;  %v377_v56 = vpop.f32.mrb[2].mxu1 }
 0x1f4   :  { %v381_v57 = vadd.f32 %v1376_v52, %v306_v55  ;;  %v308_v58 = vpop.f32.mrb[3].mxu0  ;;  %v1602_v60 = vpop.f32.mrb[3].mxu1  ;;  %v391_v17 = vadd.f32 %v2610_v29, %v377_v56  ;;  %v1381_v55 = vld [vmem:[%s2923_s0 + $0x40] sm:$0xff] }
 0x1f5   :  { %v386_v1 = vadd.f32 %v1377_v0, %v308_v58 }
 0x1f6   :  { %v382_v61 = vmul.f32 0.5, %v381_v57 }
 0x1f7   :  { %v387_v6 = vmul.f32 0.5, %v386_v1 }
 0x1f8   :  { %2270 = vtanh.f32 %v382_v61 }
 0x1f9   :  { %2272 = vtanh.f32 %v387_v6 }
 0x202   :  { %v2271_v7 = vpop.eup %2270 }
 0x203   :  { %v384_v12 = vmul.f32 0.5, %v2271_v7  ;;  %v2273_v21 = vpop.eup %2272 }
 0x204   :  { %v389_v22 = vmul.f32 0.5, %v2273_v21 }
 0x205   :  { %v385_v13 = vadd.f32 0.5, %v384_v12  ;;  %v1382_v12 = vld [vmem:[%s2923_s0 + $0x48] sm:$0xff] }
 0x206   :  { %v390_v27 = vadd.f32 0.5, %v389_v22  ;;  %v1383_v22 = vld [vmem:[%s2923_s0 + $0x50] sm:$0xff] }
 0x207   :  { %v392_v19 = vmul.f32 %v391_v17, %v385_v13 }
 0x209   :  { %v393_v20 = vadd.f32 %v1378_v18, %v392_v19 }
 0x20b   :  { %2274 = vtanh.f32 %v393_v20 }
 0x215   :  { %v2275_v25 = vpop.eup %2274 }
 0x216   :  { %v395_v28 = vsub.f32 %v2616_v51, %v2275_v25 }
 0x218   :  { %v396_v30 = vmul.f32 %v395_v28, %v390_v27 }
 0x21a   :  { %v2666_v31 = vadd.f32 %v2275_v25, %v396_v30 }
 0x21c   :  { %467 = vmatmul.mubr.f32.vlgmr.msra.gmra.mrb[4].mxu0 %v2666_v31  ;;  %1636 = vmatmul.mubr.f32.vlgmr.msra.gmra.mrb[4].mxu1 %v2666_v31 }
 0x21d   :  { %1984 = vmatpush1.bf16.msra.mxu0 %v2359_v9  ;;  %2015 = vmatpush3.bf16.msra.mxu1 %v2403_v24 }
 0x21e   :  { %1986 = vmatprep.subr.bf16.mxu0 %v2361_v10  ;;  %2016 = vmatprep.subr.bf16.mxu1 %v2312_v3 }
 0x21f   :  { %628 = vmatprep.mubr.f32.mxu0 %v2313_v4  ;;  %1670 = vmatprep.mubr.msk.f32.mxu1 %vm2314_vm0, %v2313_v4 }
 0x221   :  { %1988 = vmatpush1.bf16.msra.mxu0 %v2377_v15  ;;  %2018 = vmatpush3.bf16.msra.mxu1 %v2427_v32 }
 0x222   :  { %1990 = vmatprep.subr.bf16.mxu0 %v2380_v16  ;;  %2019 = vmatprep.subr.bf16.mxu1 %v2312_v3 }
 0x225   :  { %1992 = vmatpush1.bf16.msra.mxu0 %v2401_v23  ;;  %2021 = vmatpush3.bf16.msra.mxu1 %v2455_v41 }
 0x226   :  { %1994 = vmatprep.subr.bf16.mxu0 %v2409_v26  ;;  %2022 = vmatprep.subr.bf16.mxu1 %v2312_v3 }
 0x229   :  { %1996 = vmatpush1.bf16.msra.mxu0 %v2437_v35  ;;  %2024 = vmatpush3.bf16.msra.mxu1 %v2483_v50 }
 0x22a   :  { %1998 = vmatprep.subr.bf16.mxu0 %v2440_v36  ;;  %2025 = vmatprep.subr.bf16.mxu1 %v2312_v3 }
 0x22d   :  { %2000 = vmatpush1.bf16.msra.mxu0 %v2465_v44  ;;  %2027 = vmatpush3.bf16.msra.mxu1 %v2511_v59 }
 0x22e   :  { %2002 = vmatprep.subr.bf16.mxu0 %v2468_v45  ;;  %2028 = vmatprep.subr.bf16.mxu1 %v2312_v3 }
 0x231   :  { %2004 = vmatpush1.bf16.msra.mxu0 %v2493_v53  ;;  %2030 = vmatpush3.bf16.msra.mxu1 %v2533_v2 }
 0x232   :  { %2006 = vmatprep.subr.bf16.mxu0 %v2496_v54  ;;  %2031 = vmatprep.subr.bf16.mxu1 %v2312_v3 }
 0x235   :  { %2008 = vmatpush1.bf16.msra.mxu0 %v2521_v62  ;;  %2033 = vmatpush3.bf16.msra.mxu1 %v2547_v11 }
 0x236   :  { %2010 = vmatprep.subr.bf16.mxu0 %v2524_v63  ;;  %2034 = vmatprep.subr.bf16.mxu1 %v2312_v3 }
 0x239   :  { %2012 = vmatpush1.bf16.msra.mxu0 %v2543_v8  ;;  %2036 = vmatpush3.bf16.msra.mxu1 %v2559_v14 }
 0x23a   :  { %2038 = vmatprep.subr.bf16.mxu0 %v2346_v5  ;;  %2069 = vmatprep.subr.bf16.mxu1 %v2312_v3 }
 0x2ef   :  { %v468_v34 = vpop.f32.mrb[4].mxu0  ;;  %v539_v37 = vpop.f32.mrb[4].mxu1 }
 0x2f0   :  { %v543_v38 = vadd.f32 %v1379_v33, %v468_v34  ;;  %v470_v39 = vpop.f32.mrb[5].mxu0  ;;  %v1637_v40 = vpop.f32.mrb[5].mxu1  ;;  %v553_v52 = vadd.f32 %v2610_v29, %v539_v37  ;;  %v1384_v34 = vld [vmem:[%s2923_s0 + $0x58] sm:$0xff] }
 0x2f1   :  { %v548_v46 = vadd.f32 %v1380_v43, %v470_v39 }
 0x2f2   :  { %v544_v42 = vmul.f32 0.5, %v543_v38 }
 0x2f3   :  { %v549_v47 = vmul.f32 0.5, %v548_v46 }
 0x2f4   :  { %2276 = vtanh.f32 %v544_v42 }
 0x2f5   :  { %2278 = vtanh.f32 %v549_v47 }
 0x2fe   :  { %v2277_v48 = vpop.eup %2276 }
 0x2ff   :  { %v546_v49 = vmul.f32 0.5, %v2277_v48  ;;  %v2279_v58 = vpop.eup %2278 }
 0x300   :  { %v551_v60 = vmul.f32 0.5, %v2279_v58 }
 0x301   :  { %v547_v51 = vadd.f32 0.5, %v546_v49  ;;  %v1385_v49 = vld [vmem:[%s2923_s0 + $0x60] sm:$0xff] }
 0x302   :  { %v552_v0 = vadd.f32 0.5, %v551_v60  ;;  %v1386_v60 = vld [vmem:[%s2923_s0 + $0x68] sm:$0xff] }
 0x303   :  { %v554_v56 = vmul.f32 %v553_v52, %v547_v51 }
 0x305   :  { %v555_v57 = vadd.f32 %v1381_v55, %v554_v56 }
 0x307   :  { %2280 = vtanh.f32 %v555_v57 }
 0x311   :  { %v2281_v61 = vpop.eup %2280 }
 0x312   :  { %v557_v1 = vsub.f32 %v2666_v31, %v2281_v61 }
 0x314   :  { %v558_v6 = vmul.f32 %v557_v1, %v552_v0 }
 0x316   :  { %v2716_v7 = vadd.f32 %v2281_v61, %v558_v6 }
 0x318   :  { %629 = vmatmul.mubr.f32.vlgmr.msra.gmra.mrb[6].mxu0 %v2716_v7  ;;  %1671 = vmatmul.mubr.f32.vlgmr.msra.gmra.mrb[6].mxu1 %v2716_v7 }
 0x319   :  { %2040 = vmatpush1.bf16.msra.mxu0 %v2359_v9  ;;  %2071 = vmatpush3.bf16.msra.mxu1 %v2403_v24 }
 0x31a   :  { %2042 = vmatprep.subr.bf16.mxu0 %v2361_v10  ;;  %2072 = vmatprep.subr.bf16.mxu1 %v2312_v3 }
 0x31b   :  { %790 = vmatprep.mubr.f32.mxu0 %v2313_v4  ;;  %1705 = vmatprep.mubr.msk.f32.mxu1 %vm2314_vm0, %v2313_v4 }
 0x31d   :  { %2044 = vmatpush1.bf16.msra.mxu0 %v2377_v15  ;;  %2074 = vmatpush3.bf16.msra.mxu1 %v2427_v32 }
 0x31e   :  { %2046 = vmatprep.subr.bf16.mxu0 %v2380_v16  ;;  %2075 = vmatprep.subr.bf16.mxu1 %v2312_v3 }
 0x321   :  { %2048 = vmatpush1.bf16.msra.mxu0 %v2401_v23  ;;  %2077 = vmatpush3.bf16.msra.mxu1 %v2455_v41 }
 0x322   :  { %2050 = vmatprep.subr.bf16.mxu0 %v2409_v26  ;;  %2078 = vmatprep.subr.bf16.mxu1 %v2312_v3 }
 0x325   :  { %2052 = vmatpush1.bf16.msra.mxu0 %v2437_v35  ;;  %2080 = vmatpush3.bf16.msra.mxu1 %v2483_v50 }
 0x326   :  { %2054 = vmatprep.subr.bf16.mxu0 %v2440_v36  ;;  %2081 = vmatprep.subr.bf16.mxu1 %v2312_v3 }
 0x329   :  { %2056 = vmatpush1.bf16.msra.mxu0 %v2465_v44  ;;  %2083 = vmatpush3.bf16.msra.mxu1 %v2511_v59 }
 0x32a   :  { %2058 = vmatprep.subr.bf16.mxu0 %v2468_v45  ;;  %2084 = vmatprep.subr.bf16.mxu1 %v2312_v3 }
 0x32d   :  { %2060 = vmatpush1.bf16.msra.mxu0 %v2493_v53  ;;  %2086 = vmatpush3.bf16.msra.mxu1 %v2533_v2 }
 0x32e   :  { %2062 = vmatprep.subr.bf16.mxu0 %v2496_v54  ;;  %2087 = vmatprep.subr.bf16.mxu1 %v2312_v3 }
 0x331   :  { %2064 = vmatpush1.bf16.msra.mxu0 %v2521_v62  ;;  %2089 = vmatpush3.bf16.msra.mxu1 %v2547_v11 }
 0x332   :  { %2066 = vmatprep.subr.bf16.mxu0 %v2524_v63  ;;  %2090 = vmatprep.subr.bf16.mxu1 %v2312_v3 }
 0x335   :  { %2068 = vmatpush1.bf16.msra.mxu0 %v2543_v8  ;;  %2092 = vmatpush3.bf16.msra.mxu1 %v2559_v14 }
 0x336   :  { %2094 = vmatprep.subr.bf16.mxu0 %v2346_v5  ;;  %2125 = vmatprep.subr.bf16.mxu1 %v2312_v3 }
 0x3eb   :  { %v630_v13 = vpop.f32.mrb[6].mxu0  ;;  %v701_v17 = vpop.f32.mrb[6].mxu1 }
 0x3ec   :  { %v705_v18 = vadd.f32 %v1382_v12, %v630_v13  ;;  %v632_v19 = vpop.f32.mrb[7].mxu0  ;;  %v1672_v20 = vpop.f32.mrb[7].mxu1  ;;  %v715_v33 = vadd.f32 %v2610_v29, %v701_v17  ;;  %v1387_v13 = vld [vmem:[%s2923_s0 + $0x70] sm:$0xff] }
 0x3ed   :  { %v710_v25 = vadd.f32 %v1383_v22, %v632_v19 }
 0x3ee   :  { %v706_v21 = vmul.f32 0.5, %v705_v18 }
 0x3ef   :  { %v711_v27 = vmul.f32 0.5, %v710_v25 }
 0x3f0   :  { %2282 = vtanh.f32 %v706_v21 }
 0x3f1   :  { %2284 = vtanh.f32 %v711_v27 }
 0x3fa   :  { %v2283_v28 = vpop.eup %2282 }
 0x3fb   :  { %v708_v30 = vmul.f32 0.5, %v2283_v28  ;;  %v2285_v39 = vpop.eup %2284 }
 0x3fc   :  { %v713_v40 = vmul.f32 0.5, %v2285_v39 }
 0x3fd   :  { %v709_v31 = vadd.f32 0.5, %v708_v30  ;;  %v1388_v30 = vld [vmem:[%s2923_s0 + $0x78] sm:$0xff] }
 0x3fe   :  { %v714_v43 = vadd.f32 0.5, %v713_v40  ;;  %v1389_v40 = vld [vmem:[%s2923_s0 + $0x80] sm:$0xff] }
 0x3ff   :  { %v716_v37 = vmul.f32 %v715_v33, %v709_v31 }
 0x401   :  { %v717_v38 = vadd.f32 %v1384_v34, %v716_v37 }
 0x403   :  { %2286 = vtanh.f32 %v717_v38 }
 0x40d   :  { %v2287_v42 = vpop.eup %2286 }
 0x40e   :  { %v719_v46 = vsub.f32 %v2716_v7, %v2287_v42 }
 0x410   :  { %v720_v47 = vmul.f32 %v719_v46, %v714_v43 }
 0x412   :  { %v2766_v48 = vadd.f32 %v2287_v42, %v720_v47 }
 0x414   :  { %791 = vmatmul.mubr.f32.vlgmr.msra.gmra.mrb[8].mxu0 %v2766_v48  ;;  %1706 = vmatmul.mubr.f32.vlgmr.msra.gmra.mrb[8].mxu1 %v2766_v48 }
 0x415   :  { %2096 = vmatpush1.bf16.msra.mxu0 %v2359_v9  ;;  %2127 = vmatpush3.bf16.msra.mxu1 %v2403_v24 }
 0x416   :  { %2098 = vmatprep.subr.bf16.mxu0 %v2361_v10  ;;  %2128 = vmatprep.subr.bf16.mxu1 %v2312_v3 }
 0x417   :  { %952 = vmatprep.mubr.f32.mxu0 %v2313_v4  ;;  %1740 = vmatprep.mubr.msk.f32.mxu1 %vm2314_vm0, %v2313_v4 }
 0x419   :  { %2100 = vmatpush1.bf16.msra.mxu0 %v2377_v15  ;;  %2130 = vmatpush3.bf16.msra.mxu1 %v2427_v32 }
 0x41a   :  { %2102 = vmatprep.subr.bf16.mxu0 %v2380_v16  ;;  %2131 = vmatprep.subr.bf16.mxu1 %v2312_v3 }
 0x41d   :  { %2104 = vmatpush1.bf16.msra.mxu0 %v2401_v23  ;;  %2133 = vmatpush3.bf16.msra.mxu1 %v2455_v41 }
 0x41e   :  { %2106 = vmatprep.subr.bf16.mxu0 %v2409_v26  ;;  %2134 = vmatprep.subr.bf16.mxu1 %v2312_v3 }
 0x421   :  { %2108 = vmatpush1.bf16.msra.mxu0 %v2437_v35  ;;  %2136 = vmatpush3.bf16.msra.mxu1 %v2483_v50 }
 0x422   :  { %2110 = vmatprep.subr.bf16.mxu0 %v2440_v36  ;;  %2137 = vmatprep.subr.bf16.mxu1 %v2312_v3 }
 0x425   :  { %2112 = vmatpush1.bf16.msra.mxu0 %v2465_v44  ;;  %2139 = vmatpush3.bf16.msra.mxu1 %v2511_v59 }
 0x426   :  { %2114 = vmatprep.subr.bf16.mxu0 %v2468_v45  ;;  %2140 = vmatprep.subr.bf16.mxu1 %v2312_v3 }
 0x429   :  { %2116 = vmatpush1.bf16.msra.mxu0 %v2493_v53  ;;  %2142 = vmatpush3.bf16.msra.mxu1 %v2533_v2 }
 0x42a   :  { %2118 = vmatprep.subr.bf16.mxu0 %v2496_v54  ;;  %2143 = vmatprep.subr.bf16.mxu1 %v2312_v3 }
 0x42d   :  { %2120 = vmatpush1.bf16.msra.mxu0 %v2521_v62  ;;  %2145 = vmatpush3.bf16.msra.mxu1 %v2547_v11 }
 0x42e   :  { %2122 = vmatprep.subr.bf16.mxu0 %v2524_v63  ;;  %2146 = vmatprep.subr.bf16.mxu1 %v2312_v3 }
 0x431   :  { %2124 = vmatpush1.bf16.msra.mxu0 %v2543_v8  ;;  %2148 = vmatpush3.bf16.msra.mxu1 %v2559_v14 }
 0x432   :  { %2150 = vmatprep.subr.bf16.mxu0 %v2346_v5  ;;  %2181 = vmatprep.subr.bf16.mxu1 %v2312_v3 }
 0x4e7   :  { %v792_v51 = vpop.f32.mrb[8].mxu0  ;;  %v863_v52 = vpop.f32.mrb[8].mxu1 }
 0x4e8   :  { %v867_v55 = vadd.f32 %v1385_v49, %v792_v51  ;;  %v794_v56 = vpop.f32.mrb[9].mxu0  ;;  %v1707_v57 = vpop.f32.mrb[9].mxu1  ;;  %v877_v12 = vadd.f32 %v2610_v29, %v863_v52  ;;  %v1390_v49 = vld [vmem:[%s2923_s0 + $0x88] sm:$0xff] }
 0x4e9   :  { %v872_v61 = vadd.f32 %v1386_v60, %v794_v56 }
 0x4ea   :  { %v868_v58 = vmul.f32 0.5, %v867_v55 }
 0x4eb   :  { %v873_v0 = vmul.f32 0.5, %v872_v61 }
 0x4ec   :  { %2288 = vtanh.f32 %v868_v58 }
 0x4ed   :  { %2290 = vtanh.f32 %v873_v0 }
 0x4f6   :  { %v2289_v1 = vpop.eup %2288 }
 0x4f7   :  { %v870_v6 = vmul.f32 0.5, %v2289_v1  ;;  %v2291_v19 = vpop.eup %2290 }
 0x4f8   :  { %v875_v20 = vmul.f32 0.5, %v2291_v19 }
 0x4f9   :  { %v871_v7 = vadd.f32 0.5, %v870_v6 }
 0x4fa   :  { %v876_v22 = vadd.f32 0.5, %v875_v20 }
 0x4fb   :  { %v878_v17 = vmul.f32 %v877_v12, %v871_v7 }
 0x4fd   :  { %v879_v18 = vadd.f32 %v1387_v13, %v878_v17 }
 0x4ff   :  { %2292 = vtanh.f32 %v879_v18  ;;  %v1395_v18 = vld [vmem:[%s2923_s0 + $0xb0] sm:$0xff] }
 0x509   :  { %v2293_v21 = vpop.eup %2292 }
 0x50a   :  { %v881_v25 = vsub.f32 %v2766_v48, %v2293_v21 }
 0x50c   :  { %v882_v27 = vmul.f32 %v881_v25, %v876_v22 }
 0x50e   :  { %v2816_v28 = vadd.f32 %v2293_v21, %v882_v27 }
 0x510   :  { %953 = vmatmul.mubr.f32.vlgmr.msra.gmra.mrb[10].mxu0 %v2816_v28  ;;  %1741 = vmatmul.mubr.f32.vlgmr.msra.gmra.mrb[10].mxu1 %v2816_v28 }
 0x511   :  { %2152 = vmatpush1.bf16.msra.mxu0 %v2359_v9  ;;  %2183 = vmatpush3.bf16.msra.mxu1 %v2403_v24 }
 0x512   :  { %2154 = vmatprep.subr.bf16.mxu0 %v2361_v10  ;;  %2184 = vmatprep.subr.bf16.mxu1 %v2312_v3 }
 0x513   :  { %1114 = vmatprep.mubr.f32.mxu0 %v2313_v4  ;;  %1775 = vmatprep.mubr.msk.f32.mxu1 %vm2314_vm0, %v2313_v4 }
 0x515   :  { %2156 = vmatpush1.bf16.msra.mxu0 %v2377_v15  ;;  %2186 = vmatpush3.bf16.msra.mxu1 %v2427_v32 }
 0x516   :  { %2158 = vmatprep.subr.bf16.mxu0 %v2380_v16  ;;  %2187 = vmatprep.subr.bf16.mxu1 %v2312_v3 }
 0x519   :  { %2160 = vmatpush1.bf16.msra.mxu0 %v2401_v23  ;;  %2189 = vmatpush3.bf16.msra.mxu1 %v2455_v41 }
 0x51a   :  { %2162 = vmatprep.subr.bf16.mxu0 %v2409_v26  ;;  %2190 = vmatprep.subr.bf16.mxu1 %v2312_v3 }
 0x51d   :  { %2164 = vmatpush1.bf16.msra.mxu0 %v2437_v35  ;;  %2192 = vmatpush3.bf16.msra.mxu1 %v2483_v50 }
 0x51e   :  { %2166 = vmatprep.subr.bf16.mxu0 %v2440_v36  ;;  %2193 = vmatprep.subr.bf16.mxu1 %v2312_v3 }
 0x521   :  { %2168 = vmatpush1.bf16.msra.mxu0 %v2465_v44  ;;  %2195 = vmatpush3.bf16.msra.mxu1 %v2511_v59 }
 0x522   :  { %2170 = vmatprep.subr.bf16.mxu0 %v2468_v45  ;;  %2196 = vmatprep.subr.bf16.mxu1 %v2312_v3 }
 0x525   :  { %2172 = vmatpush1.bf16.msra.mxu0 %v2493_v53  ;;  %2198 = vmatpush3.bf16.msra.mxu1 %v2533_v2 }
 0x526   :  { %2174 = vmatprep.subr.bf16.mxu0 %v2496_v54  ;;  %2199 = vmatprep.subr.bf16.mxu1 %v2312_v3 }
 0x529   :  { %2176 = vmatpush1.bf16.msra.mxu0 %v2521_v62  ;;  %2201 = vmatpush3.bf16.msra.mxu1 %v2547_v11 }
 0x52a   :  { %2178 = vmatprep.subr.bf16.mxu0 %v2524_v63  ;;  %2202 = vmatprep.subr.bf16.mxu1 %v2312_v3 }
 0x52d   :  { %2180 = vmatpush1.bf16.msra.mxu0 %v2543_v8  ;;  %2204 = vmatpush3.bf16.msra.mxu1 %v2559_v14 }
 0x52e   :  { %2206 = vmatprep.subr.bf16.mxu0 %v2346_v5  ;;  %2237 = vmatprep.subr.bf16.mxu1 %v2312_v3 }
 0x5e3   :  { %v954_v31 = vpop.f32.mrb[10].mxu0  ;;  %v1025_v33 = vpop.f32.mrb[10].mxu1 }
 0x5e4   :  { %v1029_v34 = vadd.f32 %v1388_v30, %v954_v31  ;;  %v956_v37 = vpop.f32.mrb[11].mxu0  ;;  %v1742_v38 = vpop.f32.mrb[11].mxu1  ;;  %v1039_v48 = vadd.f32 %v2610_v29, %v1025_v33 }
 0x5e5   :  { %v1034_v42 = vadd.f32 %v1389_v40, %v956_v37 }
 0x5e6   :  { %v1030_v39 = vmul.f32 0.5, %v1029_v34 }
 0x5e7   :  { %v1035_v43 = vmul.f32 0.5, %v1034_v42 }
 0x5e8   :  { %2294 = vtanh.f32 %v1030_v39 }
 0x5e9   :  { %2296 = vtanh.f32 %v1035_v43 }
 0x5f2   :  { %v2295_v5 = vpop.eup %2294 }
 0x5f3   :  { %v1032_v46 = vmul.f32 0.5, %v2295_v5  ;;  %v2297_v55 = vpop.eup %2296 }
 0x5f4   :  { %v1037_v56 = vmul.f32 0.5, %v2297_v55 }
 0x5f5   :  { %v1033_v47 = vadd.f32 0.5, %v1032_v46 }
 0x5f6   :  { %v1038_v58 = vadd.f32 0.5, %v1037_v56 }
 0x5f7   :  { %v1040_v51 = vmul.f32 %v1039_v48, %v1033_v47 }
 0x5f9   :  { %v1041_v52 = vadd.f32 %v1390_v49, %v1040_v51 }
 0x5fb   :  { %2298 = vtanh.f32 %v1041_v52 }
 0x605   :  { %v2299_v57 = vpop.eup %2298 }
 0x606   :  { %v1043_v60 = vsub.f32 %v2816_v28, %v2299_v57  ;;  %v1396_v28 = vld [vmem:[%s2923_s0 + $0xb8] sm:$0xff] }
 0x608   :  { %v1044_v61 = vmul.f32 %v1043_v60, %v1038_v58 }
 0x60a   :  { %v1045_v0 = vadd.f32 %v2299_v57, %v1044_v61 }
 0x60c   :  { %1115 = vmatmul.mubr.f32.vlgmr.msra.gmra.mrb[12].mxu0 %v1045_v0  ;;  %1776 = vmatmul.mubr.f32.vlgmr.msra.gmra.mrb[12].mxu1 %v1045_v0 }
 0x60d   :  { %2208 = vmatpush1.bf16.msra.mxu0 %v2359_v9  ;;  %2239 = vmatpush3.bf16.msra.mxu1 %v2403_v24 }
 0x60e   :  { %2210 = vmatprep.subr.bf16.mxu0 %v2361_v10  ;;  %2240 = vmatprep.subr.bf16.mxu1 %v2312_v3 }
 0x60f   :  { %1276 = vmatprep.mubr.f32.mxu0 %v2313_v4  ;;  %1810 = vmatprep.mubr.msk.f32.mxu1 %vm2314_vm0, %v2313_v4  ;;  %v1391_v4 = vld [vmem:[%s2923_s0 + $0x90] sm:$0xff] }
 0x611   :  { %2212 = vmatpush1.bf16.msra.mxu0 %v2377_v15  ;;  %2242 = vmatpush3.bf16.msra.mxu1 %v2427_v32 }
 0x612   :  { %2214 = vmatprep.subr.bf16.mxu0 %v2380_v16  ;;  %2243 = vmatprep.subr.bf16.mxu1 %v2312_v3 }
 0x615   :  { %2216 = vmatpush1.bf16.msra.mxu0 %v2401_v23  ;;  %2245 = vmatpush3.bf16.msra.mxu1 %v2455_v41 }
 0x616   :  { %2218 = vmatprep.subr.bf16.mxu0 %v2409_v26  ;;  %2246 = vmatprep.subr.bf16.mxu1 %v2312_v3  ;;  %v1392_v26 = vld [vmem:[%s2923_s0 + $0x98] sm:$0xff] }
 0x619   :  { %2220 = vmatpush1.bf16.msra.mxu0 %v2437_v35  ;;  %2248 = vmatpush3.bf16.msra.mxu1 %v2483_v50 }
 0x61a   :  { %2222 = vmatprep.subr.bf16.mxu0 %v2440_v36  ;;  %2249 = vmatprep.subr.bf16.mxu1 %v2312_v3 }
 0x61d   :  { %2224 = vmatpush1.bf16.msra.mxu0 %v2465_v44  ;;  %2251 = vmatpush3.bf16.msra.mxu1 %v2511_v59 }
 0x61e   :  { %2226 = vmatprep.subr.bf16.mxu0 %v2468_v45  ;;  %2252 = vmatprep.subr.bf16.mxu1 %v2312_v3  ;;  %v1393_v45 = vld [vmem:[%s2923_s0 + $0xa0] sm:$0xff] }
 0x621   :  { %2228 = vmatpush1.bf16.msra.mxu0 %v2493_v53  ;;  %2254 = vmatpush3.bf16.msra.mxu1 %v2533_v2 }
 0x622   :  { %2230 = vmatprep.subr.bf16.mxu0 %v2496_v54  ;;  %2255 = vmatprep.subr.bf16.mxu1 %v2312_v3 }
 0x625   :  { %2232 = vmatpush1.bf16.msra.mxu0 %v2521_v62  ;;  %2257 = vmatpush3.bf16.msra.mxu1 %v2547_v11 }
 0x626   :  { %2234 = vmatprep.subr.bf16.mxu0 %v2524_v63  ;;  %2258 = vmatprep.subr.bf16.mxu1 %v2312_v3 }
 0x629   :  { %2236 = vmatpush1.bf16.msra.mxu0 %v2543_v8  ;;  %2260 = vmatpush3.bf16.msra.mxu1 %v2559_v14  ;;  %v1394_v14 = vld [vmem:[%s2923_s0 + $0xa8] sm:$0xff] }
 0x6df   :  { %v1116_v9 = vpop.f32.mrb[12].mxu0  ;;  %v1187_v10 = vpop.f32.mrb[12].mxu1 }
 0x6e0   :  { %v1191_v15 = vadd.f32 %v1391_v4, %v1116_v9  ;;  %v1118_v16 = vpop.f32.mrb[13].mxu0  ;;  %v1777_v23 = vpop.f32.mrb[13].mxu1  ;;  %v1201_v44 = vadd.f32 %v2610_v29, %v1187_v10 }
 0x6e1   :  { %v1196_v3 = vadd.f32 %v1392_v26, %v1118_v16 }
 0x6e2   :  { %v1192_v24 = vmul.f32 0.5, %v1191_v15 }
 0x6e3   :  { %v1197_v32 = vmul.f32 0.5, %v1196_v3 }
 0x6e4   :  { %2300 = vtanh.f32 %v1192_v24 }
 0x6e5   :  { %2302 = vtanh.f32 %v1197_v32 }
 0x6ee   :  { %v2301_v35 = vpop.eup %2300 }
 0x6ef   :  { %v1194_v36 = vmul.f32 0.5, %v2301_v35  ;;  %v2303_v54 = vpop.eup %2302 }
 0x6f0   :  { %v1199_v59 = vmul.f32 0.5, %v2303_v54 }
 0x6f1   :  { %v1195_v41 = vadd.f32 0.5, %v1194_v36 }
 0x6f2   :  { %v1200_v63 = vadd.f32 0.5, %v1199_v59 }
 0x6f3   :  { %v1202_v50 = vmul.f32 %v1201_v44, %v1195_v41 }
 0x6f5   :  { %v1203_v53 = vadd.f32 %v1393_v45, %v1202_v50 }
 0x6f7   :  { %2304 = vtanh.f32 %v1203_v53 }
 0x701   :  { %v2305_v62 = vpop.eup %2304 }
 0x702   :  { %v1205_v2 = vsub.f32 %v1045_v0, %v2305_v62 }
 0x704   :  { %v1206_v8 = vmul.f32 %v1205_v2, %v1200_v63 }
 0x706   :  { %v1207_v11 = vadd.f32 %v2305_v62, %v1206_v8 }
 0x708   :  { %1277 = vmatmul.mubr.f32.vlgmr.msra.gmra.mrb[14].mxu0 %v1207_v11  ;;  %1811 = vmatmul.mubr.f32.vlgmr.msra.gmra.mrb[14].mxu1 %v1207_v11 }
 0x7db   :  { %v1278_v1 = vpop.f32.mrb[14].mxu0  ;;  %v1349_v6 = vpop.f32.mrb[14].mxu1 }
 0x7dc   :  { %v1353_v7 = vadd.f32 %v1394_v14, %v1278_v1  ;;  %v1280_v12 = vpop.f32.mrb[15].mxu0  ;;  %v1812_v13 = vpop.f32.mrb[15].mxu1  ;;  %v1363_v27 = vadd.f32 %v2610_v29, %v1349_v6 }
 0x7dd   :  { %v1358_v19 = vadd.f32 %v1395_v18, %v1280_v12 }
 0x7de   :  { %v1354_v17 = vmul.f32 0.5, %v1353_v7 }
 0x7df   :  { %v1359_v20 = vmul.f32 0.5, %v1358_v19 }
 0x7e0   :  { %2306 = vtanh.f32 %v1354_v17 }
 0x7e1   :  { %2308 = vtanh.f32 %v1359_v20 }
 0x7ea   :  { %v2307_v21 = vpop.eup %2306 }
 0x7eb   :  { %v1356_v22 = vmul.f32 0.5, %v2307_v21  ;;  %v2309_v33 = vpop.eup %2308 }
 0x7ec   :  { %v1361_v34 = vmul.f32 0.5, %v2309_v33 }
 0x7ed   :  { %v1357_v25 = vadd.f32 0.5, %v1356_v22 }
 0x7ee   :  { %v1362_v38 = vadd.f32 0.5, %v1361_v34 }
 0x7ef   :  { %v1364_v30 = vmul.f32 %v1363_v27, %v1357_v25 }
 0x7f1   :  { %v1365_v31 = vadd.f32 %v1396_v28, %v1364_v30 }
 0x7f3   :  { %2310 = vtanh.f32 %v1365_v31 }
 0x7fd   :  { %v2311_v37 = vpop.eup %2310 }
 0x7fe   :  { %v1367_v39 = vsub.f32 %v1207_v11, %v2311_v37 }
 0x800   :  { %v1368_v40 = vmul.f32 %v1367_v39, %v1362_v38 }
 0x802   :  { %v1369_v42 = vadd.f32 %v2311_v37, %v1368_v40 }
 0x804   :  { %1370 = vst [vmem:[%s2925_s3] sm:$0xff] %v1369_v42 }

</bundles_post_ra>
